<compile_context>
chip_gen: v7x
topology: tpu7x:2x2x1
jax: 0.10.0
libtpu: 0.0.40
codegen_flags: <defaults>
</compile_context>

<pallas_src>
import functools

import jax
import jax.numpy as jnp
import numpy as np
from jax.experimental import pallas as pl
from jax.experimental.pallas import tpu as pltpu

# ----------------------------- config (small shapes) -----------------------------
DIM = 3          # self.dim (point channels kept)
C_DIM = 13       # c_dim
HIDDEN = 32      # hidden_size
GROUPS = 4       # gn_groups (must divide HIDDEN)
NUM_BLOCKS = 4   # block0..block3
EPS = 1e-5       # nn.GroupNorm default
P_HI = jax.lax.Precision.HIGHEST

# Data-tile sublane layout: rows [0, B) = per-sample lane masks, rows [B, B+DIM) =
# point channels, remaining rows are zero padding (one full 8-sublane tile).
XIN_ROWS = 8

# Packed per-channel parameter table -- column offsets shared by wrapper + kernel.
O_WCAT = 0                       # (H, XIN_ROWS) eff. fc_p weight: [bias_eff | z_scale*wp_pt | 0]
O_G = O_WCAT + XIN_ROWS          # (H, NB)  per-block GN gamma
O_BE = O_G + NUM_BLOCKS          # (H, NB)  per-block GN beta
O_CB = O_BE + NUM_BLOCKS         # (H, NB)  per-block conv bias
O_GF = O_CB + NUM_BLOCKS         # (H, 1)   final GN gamma
O_BF = O_GF + 1                  # (H, 1)   final GN beta
O_WO = O_BF + 1                  # (H, 1)   fc_out weight (as a column)
O_BO = O_WO + 1                  # (H, 1)   fc_out bias (replicated down the column)
NPCOL = O_BO + 1                 # = 24, padded to HIDDEN lanes inside the slab

# Parameter-slab sublane (row) offsets -- all multiples of 8 (free static slices).
R_WBLK = 0                               # (NB*H, H) residual conv weights, W_i at rows [32i, 32i+32)
R_GMAT = R_WBLK + NUM_BLOCKS * HIDDEN    # (H, H)    channel->group pooling, pre-scaled by 1/(cg*T)
R_PVEC = R_GMAT + HIDDEN                 # (H, H)    packed per-channel parameter table
SLAB_ROWS = R_PVEC + HIDDEN              # = 192


# ----------------------------- the fused kernel -----------------------------
def decoder_kernel(xin_ref, slab_ref, out_ref, *, bsz, tlen):
    """One grid step over the whole problem (N = bsz * tlen lanes).

    xin_ref  : (XIN_ROWS, N)   rows [0,bsz)=sample membership, [bsz,bsz+DIM)=points
    slab_ref : (SLAB_ROWS, H)  all parameters in one table (see row offsets above)
    out_ref  : (1, N)          decoder output (lane-dense store)
    """
    xin = xin_ref[...]
    slab = slab_ref[...]

    gmat = slab[R_GMAT:R_GMAT + HIDDEN, :]          # (H, H) already scaled by 1/(cg*T)
    pv = slab[R_PVEC:R_PVEC + HIDDEN, :]            # (H, H) packed per-channel params

    def group_norm(x, gamma, beta):
        # Per-sample GroupNorm on (H, N).  Sample b occupies the lane-aligned slice
        # [b*tlen, (b+1)*tlen) (T = 128 -> free vreg-aligned views).  Lane reduces are
        # exact f32 on the XLU; channel->group pooling is ONE batched MXU push.
        # NOTE: single-pass var = E[x^2] - mean^2 in f32 -- fine for O(1) activations.
        s1_cols, s2_cols = [], []
        for b in range(bsz):                                         # static unroll
            xb = x[:, b * tlen:(b + 1) * tlen]                       # (H, T) aligned view
            s1_cols.append(jnp.sum(xb, axis=1, keepdims=True))
            s2_cols.append(jnp.sum(xb * xb, axis=1, keepdims=True))
        stats = jnp.concatenate(s1_cols + s2_cols, axis=1)           # (H, 2B)
        pooled = jnp.dot(gmat, stats, preferred_element_type=jnp.float32)
        mean = pooled[:, :bsz]                                       # (H, B) group means
        var = pooled[:, bsz:2 * bsz] - mean * mean                   # biased (matches torch)
        sc = gamma * jax.lax.rsqrt(var + EPS)                        # (H, B)
        sh = beta - mean * sc                                        # (H, B)
        # Affine per lane-aligned segment; the 128-lane-boundary concat is free vreg
        # composition, so the whole affine is ~2 full-width VPU passes.
        segs = [x[:, b * tlen:(b + 1) * tlen] * sc[:, b:b + 1] + sh[:, b:b + 1]
                for b in range(bsz)]
        return jnp.concatenate(segs, axis=1)                         # (H, N)

    # fc_p: one (H, 8)@(8, N) MXU push.  The per-sample effective bias (from c) rides
    # on the sample-membership rows of xin; z_scale is folded into the point weights.
    net = jnp.dot(pv[:, O_WCAT:O_WCAT + XIN_ROWS], xin,
                  preferred_element_type=jnp.float32)                # (H, N)

    # 4 shallow GN residual blocks: net += W_i @ relu(GN(net)) + b_i   (MXU matmuls)
    for i in range(NUM_BLOCKS):                                      # static unroll
        h = group_norm(net, pv[:, O_G + i:O_G + i + 1], pv[:, O_BE + i:O_BE + i + 1])
        h = jnp.maximum(h, 0.0)                                      # ReLU (leaky=False)
        w_i = slab[R_WBLK + i * HIDDEN:R_WBLK + (i + 1) * HIDDEN, :]  # sublane-aligned slice
        net = net + jnp.dot(w_i, h, preferred_element_type=jnp.float32) \
                  + pv[:, O_CB + i:O_CB + i + 1]

    # final GN -> ReLU -> fc_out.  fc_out is a 1-row conv: VPU multiply + XLU sublane
    # reduce (cheaper than a single-result-row masked MXU matmul).
    h = group_norm(net, pv[:, O_GF:O_GF + 1], pv[:, O_BF:O_BF + 1])
    h = jnp.maximum(h, 0.0)
    out = jnp.sum(h * pv[:, O_WO:O_WO + 1], axis=0, keepdims=True) + pv[0:1, O_BO:O_BO + 1]
    out_ref[...] = out                                               # (1, N) lane-dense store


# ----------------------------- wrapper -----------------------------
def _forward_impl(p, z, c, params, z_scale):
    """p: (B, T, D_full), z: unused (matches PyTorch forward), c: (B, c_dim)."""
    del z  # never used by the reference forward pass
    B, T, D_full = p.shape
    N = B * T
    assert B + DIM <= XIN_ROWS, "increase XIN_ROWS for larger batch"
    cg = HIDDEN // GROUPS

    # point channels, batch folded into lanes (z_scale folded into the weights below)
    pt = jnp.transpose(p[:, :, D_full - DIM:].astype(jnp.float32), (2, 0, 1)).reshape(DIM, N)

    # 13 c-channels are constant over T -> fc_p contribution collapses to a per-sample bias
    wp = params["wp"].astype(jnp.float32)
    bias_eff = jnp.einsum("hk,bk->hb", wp[:, DIM:], c.astype(jnp.float32),
                          precision=P_HI) + params["bp"]                       # (H, B)

    # DMA #1 -- data tile: [sample-membership rows | point channels | zero padding]
    segT = jnp.asarray((np.arange(N) // T == np.arange(B)[:, None]).astype(np.float32))
    xin = jnp.concatenate(
        [segT, pt, jnp.zeros((XIN_ROWS - B - DIM, N), jnp.float32)], axis=0)   # (8, N)

    # effective fc_p weight, column order matching the xin row order
    wcat = jnp.concatenate(
        [bias_eff, z_scale * wp[:, :DIM],
         jnp.zeros((HIDDEN, XIN_ROWS - B - DIM), jnp.float32)], axis=1)        # (H, 8)

    pvec = jnp.concatenate([
        wcat,                                        # cols [O_WCAT, O_WCAT + 8)
        params["gblk"][:, :, 0].T,                   # per-block GN gamma
        params["betablk"][:, :, 0].T,                # per-block GN beta
        params["bblk"][:, :, 0].T,                   # per-block conv bias
        params["gfin"], params["betafin"],           # final GN gamma / beta
        params["wout"].T,                            # fc_out weight as a column
        jnp.broadcast_to(params["bout"], (HIDDEN, 1)),
    ], axis=1)
    # guard against silent drift between the packing order and the kernel's offsets
    assert pvec.shape == (HIDDEN, NPCOL), pvec.shape
    pvec = jnp.pad(pvec, ((0, 0), (0, HIDDEN - NPCOL)))

    # channel->group pooling matrix, pre-scaled by 1/(cg*T)  (constant under jit)
    gid = np.arange(HIDDEN) // cg
    gmat = jnp.asarray((gid[:, None] == gid[None, :]).astype(np.float32) / float(cg * T))

    # DMA #2 -- one parameter slab: residual conv weights + gmat + packed params
    slab = jnp.concatenate([
        params["wblk"].astype(jnp.float32).reshape(NUM_BLOCKS * HIDDEN, HIDDEN),
        gmat,
        pvec,
    ], axis=0)
    assert slab.shape == (SLAB_ROWS, HIDDEN), slab.shape

    flops = (2 * NUM_BLOCKS * HIDDEN * HIDDEN * N        # residual 1x1 convs
             + 2 * HIDDEN * XIN_ROWS * N                 # fc_p
             + (NUM_BLOCKS + 1) * 8 * HIDDEN * N)        # GN stats / affine / ReLU / fc_out
    bytes_accessed = (xin.size + slab.size + N) * 4

    # NOTE: single TensorCore / grid=(1,) is right at this size on v5e/v6e/v7x; only
    # shard over B (never T -- GN stats are per-sample) once B*T per core is ~1-2K lanes.
    kernel = pl.pallas_call(
        functools.partial(decoder_kernel, bsz=B, tlen=T),
        out_shape=jax.ShapeDtypeStruct((1, N), jnp.float32),
        grid=(1,),
        in_specs=[
            pl.BlockSpec((XIN_ROWS, N), lambda i: (0, 0)),          # data tile
            pl.BlockSpec((SLAB_ROWS, HIDDEN), lambda i: (0, 0)),    # parameter slab
        ],
        out_specs=pl.BlockSpec((1, N), lambda i: (0, 0)),
        compiler_params=pltpu.CompilerParams(dimension_semantics=("arbitrary",)),
        cost_estimate=pl.CostEstimate(
            flops=int(flops),
            transcendentals=int((NUM_BLOCKS + 1) * HIDDEN * B),     # rsqrt per GN call
            bytes_accessed=int(bytes_accessed)),
    )
    out = kernel(xin, slab)
    return out.reshape(B, T)


nasa_decoder_forward = jax.jit(_forward_impl)


# ----------------------------- pure-JAX reference -----------------------------
def _group_norm_ref(x, gamma, beta):
    B, C, T = x.shape
    cg = C // GROUPS
    xg = x.reshape(B, GROUPS, cg, T)
    mean = xg.mean(axis=(2, 3), keepdims=True)
    var = ((xg - mean) ** 2).mean(axis=(2, 3), keepdims=True)
    xn = ((xg - mean) * jax.lax.rsqrt(var + EPS)).reshape(B, C, T)
    return xn * gamma[None] + beta[None]


def nasa_decoder_reference(p, z, c, params, z_scale):
    del z
    B, T, D_full = p.shape
    pt = jnp.transpose(p, (0, 2, 1))[:, D_full - DIM:, :] * z_scale
    cb = jnp.broadcast_to(c[:, :, None], (B, C_DIM, T))
    x = jnp.concatenate([pt, cb], axis=1).astype(jnp.float32)
    net = jnp.einsum("oc,bct->bot", params["wp"], x, precision=P_HI) + params["bp"][None]
    for i in range(NUM_BLOCKS):
        h = jnp.maximum(_group_norm_ref(net, params["gblk"][i], params["betablk"][i]), 0.0)
        net = net + jnp.einsum("oc,bct->bot", params["wblk"][i], h,
                               precision=P_HI) + params["bblk"][i][None]
    h = jnp.maximum(_group_norm_ref(net, params["gfin"], params["betafin"]), 0.0)
    out = jnp.einsum("oc,bct->bot", params["wout"], h, precision=P_HI) + params["bout"][None]
    return out[:, 0, :]


# ----------------------------- parameter init -----------------------------
def init_params(key):
    cin = DIM + C_DIM
    ks = jax.random.split(key, 12)
    # NOTE: the original block zero-inits its conv weight; synthetic random init is
    # used here so the kernel actually exercises the residual path.
    return {
        "wp": 0.2 * jax.random.normal(ks[0], (HIDDEN, cin), jnp.float32),
        "bp": 0.1 * jax.random.normal(ks[1], (HIDDEN, 1), jnp.float32),
        "wblk": 0.1 * jax.random.normal(ks[2], (NUM_BLOCKS, HIDDEN, HIDDEN), jnp.float32),
        "bblk": 0.1 * jax.random.normal(ks[3], (NUM_BLOCKS, HIDDEN, 1), jnp.float32),
        "gblk": 1.0 + 0.1 * jax.random.normal(ks[4], (NUM_BLOCKS, HIDDEN, 1), jnp.float32),
        "betablk": 0.1 * jax.random.normal(ks[5], (NUM_BLOCKS, HIDDEN, 1), jnp.float32),
        "gfin": 1.0 + 0.1 * jax.random.normal(ks[6], (HIDDEN, 1), jnp.float32),
        "betafin": 0.1 * jax.random.normal(ks[7], (HIDDEN, 1), jnp.float32),
        "wout": 0.2 * jax.random.normal(ks[8], (1, HIDDEN), jnp.float32),
        "bout": 0.1 * jax.random.normal(ks[9], (1, 1), jnp.float32),
    }


if __name__ == "__main__":
    key = jax.random.PRNGKey(0)
    kp, kz, kc, kw = jax.random.split(key, 4)

    B, T, D_full, Z_DIM = 2, 128, 5, 8
    p = jax.random.normal(kp, (B, T, D_full), jnp.float32)
    z = jax.random.normal(kz, (B, Z_DIM), jnp.float32)     # unused, as in PyTorch forward
    c = jax.random.normal(kc, (B, C_DIM), jnp.float32)
    z_scale = 2.0
    params = init_params(kw)

    out = jax.block_until_ready(nasa_decoder_forward(p, z, c, params, z_scale))
    assert out.shape == (B, T), out.shape

    ref = jax.block_until_ready(nasa_decoder_reference(p, z, c, params, z_scale))
    # tolerance leaves headroom for MXU-vs-XLA matmul pass-rounding differences on the
    # residual convs / fc_p; all normalization statistics are exact f32 in the kernel.
    assert jnp.allclose(out, ref, rtol=5e-3, atol=5e-3), float(jnp.max(jnp.abs(out - ref)))

    print("KERNEL_OK")
</pallas_src>

<mosaic_0001>
module attributes {stable_mosaic.version = 11 : i64} {
  func.func @decoder_kernel(%arg0: i32, %arg1: memref<8x256xf32, #tpu.memory_space<vmem>>, %arg2: memref<192x32xf32, #tpu.memory_space<vmem>>, %arg3: memref<1x256xf32, #tpu.memory_space<vmem>>) attributes {dimension_semantics = [#tpu.dimension_semantics<arbitrary>], iteration_bounds = array<i64: 1>, scalar_prefetch = 0 : i64, scratch_operands = 0 : i64, tpu.core_type = #tpu.core_type<tc>, window_params = [{pipeline_mode = #tpu.pipeline_mode<synchronous>, transform_indices = @transform_0, window_bounds = array<i64: 8, 256>}, {pipeline_mode = #tpu.pipeline_mode<synchronous>, transform_indices = @transform_1, window_bounds = array<i64: 192, 32>}, {pipeline_mode = #tpu.pipeline_mode<synchronous>, transform_indices = @transform_2, window_bounds = array<i64: 1, 256>}]} {
    %c0 = arith.constant 0 : index
    %c0_0 = arith.constant 0 : index
    %0 = vector.load %arg1[%c0, %c0_0] : memref<8x256xf32, #tpu.memory_space<vmem>>, vector<8x256xf32>
    %c0_1 = arith.constant 0 : index
    %c0_2 = arith.constant 0 : index
    %1 = vector.load %arg2[%c0_1, %c0_2] : memref<192x32xf32, #tpu.memory_space<vmem>>, vector<192x32xf32>
    %2 = vector.extract_strided_slice %1 {offsets = [128, 0], sizes = [32, 32], strides = [1, 1]} : vector<192x32xf32> to vector<32x32xf32>
    %3 = vector.extract_strided_slice %1 {offsets = [160, 0], sizes = [32, 32], strides = [1, 1]} : vector<192x32xf32> to vector<32x32xf32>
    %4 = vector.extract_strided_slice %3 {offsets = [0, 0], sizes = [32, 8], strides = [1, 1]} : vector<32x32xf32> to vector<32x8xf32>
    %cst = arith.constant dense<0.000000e+00> : vector<32x256xf32>
    %5 = tpu.matmul %4, %0, %cst {dimension_numbers = #tpu.dot_dimension_numbers<[1], [0], [0], [1], [0, 0, 1, 1], [], []>} : vector<32x8xf32>, vector<8x256xf32>, vector<32x256xf32> -> vector<32x256xf32>
    %6 = vector.extract_strided_slice %3 {offsets = [0, 8], sizes = [32, 1], strides = [1, 1]} : vector<32x32xf32> to vector<32x1xf32>
    %7 = vector.extract_strided_slice %3 {offsets = [0, 12], sizes = [32, 1], strides = [1, 1]} : vector<32x32xf32> to vector<32x1xf32>
    %8 = vector.extract_strided_slice %5 {offsets = [0, 0], sizes = [32, 128], strides = [1, 1]} : vector<32x256xf32> to vector<32x128xf32>
    %cst_3 = arith.constant dense<0.000000e+00> : vector<32xf32>
    %9 = vector.multi_reduction <add>, %8, %cst_3 [1] : vector<32x128xf32> to vector<32xf32>
    %10 = vector.shape_cast %9 : vector<32xf32> to vector<32x1xf32>
    %11 = arith.mulf %8, %8 : vector<32x128xf32>
    %cst_4 = arith.constant dense<0.000000e+00> : vector<32xf32>
    %12 = vector.multi_reduction <add>, %11, %cst_4 [1] : vector<32x128xf32> to vector<32xf32>
    %13 = vector.shape_cast %12 : vector<32xf32> to vector<32x1xf32>
    %14 = vector.extract_strided_slice %5 {offsets = [0, 128], sizes = [32, 128], strides = [1, 1]} : vector<32x256xf32> to vector<32x128xf32>
    %cst_5 = arith.constant dense<0.000000e+00> : vector<32xf32>
    %15 = vector.multi_reduction <add>, %14, %cst_5 [1] : vector<32x128xf32> to vector<32xf32>
    %16 = vector.shape_cast %15 : vector<32xf32> to vector<32x1xf32>
    %17 = arith.mulf %14, %14 : vector<32x128xf32>
    %cst_6 = arith.constant dense<0.000000e+00> : vector<32xf32>
    %18 = vector.multi_reduction <add>, %17, %cst_6 [1] : vector<32x128xf32> to vector<32xf32>
    %19 = vector.shape_cast %18 : vector<32xf32> to vector<32x1xf32>
    %20 = tpu.concatenate %10, %16, %13, %19 in 1 : vector<32x1xf32>, vector<32x1xf32>, vector<32x1xf32>, vector<32x1xf32> -> vector<32x4xf32>
    %cst_7 = arith.constant dense<0.000000e+00> : vector<32x4xf32>
    %21 = tpu.matmul %2, %20, %cst_7 {dimension_numbers = #tpu.dot_dimension_numbers<[1], [0], [0], [1], [0, 0, 1, 1], [], []>} : vector<32x32xf32>, vector<32x4xf32>, vector<32x4xf32> -> vector<32x4xf32>
    %22 = vector.extract_strided_slice %21 {offsets = [0, 0], sizes = [32, 2], strides = [1, 1]} : vector<32x4xf32> to vector<32x2xf32>
    %23 = vector.extract_strided_slice %21 {offsets = [0, 2], sizes = [32, 2], strides = [1, 1]} : vector<32x4xf32> to vector<32x2xf32>
    %24 = arith.mulf %22, %22 : vector<32x2xf32>
    %25 = arith.subf %23, %24 : vector<32x2xf32>
    %cst_8 = arith.constant 9.99999974E-6 : f32
    %26 = vector.broadcast %cst_8 : f32 to vector<32x2xf32>
    %27 = arith.addf %25, %26 : vector<32x2xf32>
    %28 = math.rsqrt %27 : vector<32x2xf32>
    %29 = vector.broadcast %6 : vector<32x1xf32> to vector<32x2xf32>
    %30 = arith.mulf %29, %28 : vector<32x2xf32>
    %31 = arith.mulf %22, %30 : vector<32x2xf32>
    %32 = vector.broadcast %7 : vector<32x1xf32> to vector<32x2xf32>
    %33 = arith.subf %32, %31 : vector<32x2xf32>
    %34 = vector.extract_strided_slice %5 {offsets = [0, 0], sizes = [32, 128], strides = [1, 1]} : vector<32x256xf32> to vector<32x128xf32>
    %35 = vector.extract_strided_slice %30 {offsets = [0, 0], sizes = [32, 1], strides = [1, 1]} : vector<32x2xf32> to vector<32x1xf32>
    %36 = vector.broadcast %35 : vector<32x1xf32> to vector<32x128xf32>
    %37 = arith.mulf %34, %36 : vector<32x128xf32>
    %38 = vector.extract_strided_slice %33 {offsets = [0, 0], sizes = [32, 1], strides = [1, 1]} : vector<32x2xf32> to vector<32x1xf32>
    %39 = vector.broadcast %38 : vector<32x1xf32> to vector<32x128xf32>
    %40 = arith.addf %37, %39 : vector<32x128xf32>
    %41 = vector.extract_strided_slice %5 {offsets = [0, 128], sizes = [32, 128], strides = [1, 1]} : vector<32x256xf32> to vector<32x128xf32>
    %42 = vector.extract_strided_slice %30 {offsets = [0, 1], sizes = [32, 1], strides = [1, 1]} : vector<32x2xf32> to vector<32x1xf32>
    %43 = vector.broadcast %42 : vector<32x1xf32> to vector<32x128xf32>
    %44 = arith.mulf %41, %43 : vector<32x128xf32>
    %45 = vector.extract_strided_slice %33 {offsets = [0, 1], sizes = [32, 1], strides = [1, 1]} : vector<32x2xf32> to vector<32x1xf32>
    %46 = vector.broadcast %45 : vector<32x1xf32> to vector<32x128xf32>
    %47 = arith.addf %44, %46 : vector<32x128xf32>
    %48 = tpu.concatenate %40, %47 in 1 : vector<32x128xf32>, vector<32x128xf32> -> vector<32x256xf32>
    %cst_9 = arith.constant 0.000000e+00 : f32
    %49 = vector.broadcast %cst_9 : f32 to vector<32x256xf32>
    %50 = arith.maximumf %48, %49 : vector<32x256xf32>
    %51 = vector.extract_strided_slice %1 {offsets = [0, 0], sizes = [32, 32], strides = [1, 1]} : vector<192x32xf32> to vector<32x32xf32>
    %cst_10 = arith.constant dense<0.000000e+00> : vector<32x256xf32>
    %52 = tpu.matmul %51, %50, %cst_10 {dimension_numbers = #tpu.dot_dimension_numbers<[1], [0], [0], [1], [0, 0, 1, 1], [], []>} : vector<32x32xf32>, vector<32x256xf32>, vector<32x256xf32> -> vector<32x256xf32>
    %53 = arith.addf %5, %52 : vector<32x256xf32>
    %54 = vector.extract_strided_slice %3 {offsets = [0, 16], sizes = [32, 1], strides = [1, 1]} : vector<32x32xf32> to vector<32x1xf32>
    %55 = vector.broadcast %54 : vector<32x1xf32> to vector<32x256xf32>
    %56 = arith.addf %53, %55 : vector<32x256xf32>
    %57 = vector.extract_strided_slice %3 {offsets = [0, 9], sizes = [32, 1], strides = [1, 1]} : vector<32x32xf32> to vector<32x1xf32>
    %58 = vector.extract_strided_slice %3 {offsets = [0, 13], sizes = [32, 1], strides = [1, 1]} : vector<32x32xf32> to vector<32x1xf32>
    %59 = vector.extract_strided_slice %56 {offsets = [0, 0], sizes = [32, 128], strides = [1, 1]} : vector<32x256xf32> to vector<32x128xf32>
    %cst_11 = arith.constant dense<0.000000e+00> : vector<32xf32>
    %60 = vector.multi_reduction <add>, %59, %cst_11 [1] : vector<32x128xf32> to vector<32xf32>
    %61 = vector.shape_cast %60 : vector<32xf32> to vector<32x1xf32>
    %62 = arith.mulf %59, %59 : vector<32x128xf32>
    %cst_12 = arith.constant dense<0.000000e+00> : vector<32xf32>
    %63 = vector.multi_reduction <add>, %62, %cst_12 [1] : vector<32x128xf32> to vector<32xf32>
    %64 = vector.shape_cast %63 : vector<32xf32> to vector<32x1xf32>
    %65 = vector.extract_strided_slice %56 {offsets = [0, 128], sizes = [32, 128], strides = [1, 1]} : vector<32x256xf32> to vector<32x128xf32>
    %cst_13 = arith.constant dense<0.000000e+00> : vector<32xf32>
    %66 = vector.multi_reduction <add>, %65, %cst_13 [1] : vector<32x128xf32> to vector<32xf32>
    %67 = vector.shape_cast %66 : vector<32xf32> to vector<32x1xf32>
    %68 = arith.mulf %65, %65 : vector<32x128xf32>
    %cst_14 = arith.constant dense<0.000000e+00> : vector<32xf32>
    %69 = vector.multi_reduction <add>, %68, %cst_14 [1] : vector<32x128xf32> to vector<32xf32>
    %70 = vector.shape_cast %69 : vector<32xf32> to vector<32x1xf32>
    %71 = tpu.concatenate %61, %67, %64, %70 in 1 : vector<32x1xf32>, vector<32x1xf32>, vector<32x1xf32>, vector<32x1xf32> -> vector<32x4xf32>
    %cst_15 = arith.constant dense<0.000000e+00> : vector<32x4xf32>
    %72 = tpu.matmul %2, %71, %cst_15 {dimension_numbers = #tpu.dot_dimension_numbers<[1], [0], [0], [1], [0, 0, 1, 1], [], []>} : vector<32x32xf32>, vector<32x4xf32>, vector<32x4xf32> -> vector<32x4xf32>
    %73 = vector.extract_strided_slice %72 {offsets = [0, 0], sizes = [32, 2], strides = [1, 1]} : vector<32x4xf32> to vector<32x2xf32>
    %74 = vector.extract_strided_slice %72 {offsets = [0, 2], sizes = [32, 2], strides = [1, 1]} : vector<32x4xf32> to vector<32x2xf32>
    %75 = arith.mulf %73, %73 : vector<32x2xf32>
    %76 = arith.subf %74, %75 : vector<32x2xf32>
    %cst_16 = arith.constant 9.99999974E-6 : f32
    %77 = vector.broadcast %cst_16 : f32 to vector<32x2xf32>
    %78 = arith.addf %76, %77 : vector<32x2xf32>
    %79 = math.rsqrt %78 : vector<32x2xf32>
    %80 = vector.broadcast %57 : vector<32x1xf32> to vector<32x2xf32>
    %81 = arith.mulf %80, %79 : vector<32x2xf32>
    %82 = arith.mulf %73, %81 : vector<32x2xf32>
    %83 = vector.broadcast %58 : vector<32x1xf32> to vector<32x2xf32>
    %84 = arith.subf %83, %82 : vector<32x2xf32>
    %85 = vector.extract_strided_slice %56 {offsets = [0, 0], sizes = [32, 128], strides = [1, 1]} : vector<32x256xf32> to vector<32x128xf32>
    %86 = vector.extract_strided_slice %81 {offsets = [0, 0], sizes = [32, 1], strides = [1, 1]} : vector<32x2xf32> to vector<32x1xf32>
    %87 = vector.broadcast %86 : vector<32x1xf32> to vector<32x128xf32>
    %88 = arith.mulf %85, %87 : vector<32x128xf32>
    %89 = vector.extract_strided_slice %84 {offsets = [0, 0], sizes = [32, 1], strides = [1, 1]} : vector<32x2xf32> to vector<32x1xf32>
    %90 = vector.broadcast %89 : vector<32x1xf32> to vector<32x128xf32>
    %91 = arith.addf %88, %90 : vector<32x128xf32>
    %92 = vector.extract_strided_slice %56 {offsets = [0, 128], sizes = [32, 128], strides = [1, 1]} : vector<32x256xf32> to vector<32x128xf32>
    %93 = vector.extract_strided_slice %81 {offsets = [0, 1], sizes = [32, 1], strides = [1, 1]} : vector<32x2xf32> to vector<32x1xf32>
    %94 = vector.broadcast %93 : vector<32x1xf32> to vector<32x128xf32>
    %95 = arith.mulf %92, %94 : vector<32x128xf32>
    %96 = vector.extract_strided_slice %84 {offsets = [0, 1], sizes = [32, 1], strides = [1, 1]} : vector<32x2xf32> to vector<32x1xf32>
    %97 = vector.broadcast %96 : vector<32x1xf32> to vector<32x128xf32>
    %98 = arith.addf %95, %97 : vector<32x128xf32>
    %99 = tpu.concatenate %91, %98 in 1 : vector<32x128xf32>, vector<32x128xf32> -> vector<32x256xf32>
    %cst_17 = arith.constant 0.000000e+00 : f32
    %100 = vector.broadcast %cst_17 : f32 to vector<32x256xf32>
    %101 = arith.maximumf %99, %100 : vector<32x256xf32>
    %102 = vector.extract_strided_slice %1 {offsets = [32, 0], sizes = [32, 32], strides = [1, 1]} : vector<192x32xf32> to vector<32x32xf32>
    %cst_18 = arith.constant dense<0.000000e+00> : vector<32x256xf32>
    %103 = tpu.matmul %102, %101, %cst_18 {dimension_numbers = #tpu.dot_dimension_numbers<[1], [0], [0], [1], [0, 0, 1, 1], [], []>} : vector<32x32xf32>, vector<32x256xf32>, vector<32x256xf32> -> vector<32x256xf32>
    %104 = arith.addf %56, %103 : vector<32x256xf32>
    %105 = vector.extract_strided_slice %3 {offsets = [0, 17], sizes = [32, 1], strides = [1, 1]} : vector<32x32xf32> to vector<32x1xf32>
    %106 = vector.broadcast %105 : vector<32x1xf32> to vector<32x256xf32>
    %107 = arith.addf %104, %106 : vector<32x256xf32>
    %108 = vector.extract_strided_slice %3 {offsets = [0, 10], sizes = [32, 1], strides = [1, 1]} : vector<32x32xf32> to vector<32x1xf32>
    %109 = vector.extract_strided_slice %3 {offsets = [0, 14], sizes = [32, 1], strides = [1, 1]} : vector<32x32xf32> to vector<32x1xf32>
    %110 = vector.extract_strided_slice %107 {offsets = [0, 0], sizes = [32, 128], strides = [1, 1]} : vector<32x256xf32> to vector<32x128xf32>
    %cst_19 = arith.constant dense<0.000000e+00> : vector<32xf32>
    %111 = vector.multi_reduction <add>, %110, %cst_19 [1] : vector<32x128xf32> to vector<32xf32>
    %112 = vector.shape_cast %111 : vector<32xf32> to vector<32x1xf32>
    %113 = arith.mulf %110, %110 : vector<32x128xf32>
    %cst_20 = arith.constant dense<0.000000e+00> : vector<32xf32>
    %114 = vector.multi_reduction <add>, %113, %cst_20 [1] : vector<32x128xf32> to vector<32xf32>
    %115 = vector.shape_cast %114 : vector<32xf32> to vector<32x1xf32>
    %116 = vector.extract_strided_slice %107 {offsets = [0, 128], sizes = [32, 128], strides = [1, 1]} : vector<32x256xf32> to vector<32x128xf32>
    %cst_21 = arith.constant dense<0.000000e+00> : vector<32xf32>
    %117 = vector.multi_reduction <add>, %116, %cst_21 [1] : vector<32x128xf32> to vector<32xf32>
    %118 = vector.shape_cast %117 : vector<32xf32> to vector<32x1xf32>
    %119 = arith.mulf %116, %116 : vector<32x128xf32>
    %cst_22 = arith.constant dense<0.000000e+00> : vector<32xf32>
    %120 = vector.multi_reduction <add>, %119, %cst_22 [1] : vector<32x128xf32> to vector<32xf32>
    %121 = vector.shape_cast %120 : vector<32xf32> to vector<32x1xf32>
    %122 = tpu.concatenate %112, %118, %115, %121 in 1 : vector<32x1xf32>, vector<32x1xf32>, vector<32x1xf32>, vector<32x1xf32> -> vector<32x4xf32>
    %cst_23 = arith.constant dense<0.000000e+00> : vector<32x4xf32>
    %123 = tpu.matmul %2, %122, %cst_23 {dimension_numbers = #tpu.dot_dimension_numbers<[1], [0], [0], [1], [0, 0, 1, 1], [], []>} : vector<32x32xf32>, vector<32x4xf32>, vector<32x4xf32> -> vector<32x4xf32>
    %124 = vector.extract_strided_slice %123 {offsets = [0, 0], sizes = [32, 2], strides = [1, 1]} : vector<32x4xf32> to vector<32x2xf32>
    %125 = vector.extract_strided_slice %123 {offsets = [0, 2], sizes = [32, 2], strides = [1, 1]} : vector<32x4xf32> to vector<32x2xf32>
    %126 = arith.mulf %124, %124 : vector<32x2xf32>
    %127 = arith.subf %125, %126 : vector<32x2xf32>
    %cst_24 = arith.constant 9.99999974E-6 : f32
    %128 = vector.broadcast %cst_24 : f32 to vector<32x2xf32>
    %129 = arith.addf %127, %128 : vector<32x2xf32>
    %130 = math.rsqrt %129 : vector<32x2xf32>
    %131 = vector.broadcast %108 : vector<32x1xf32> to vector<32x2xf32>
    %132 = arith.mulf %131, %130 : vector<32x2xf32>
    %133 = arith.mulf %124, %132 : vector<32x2xf32>
    %134 = vector.broadcast %109 : vector<32x1xf32> to vector<32x2xf32>
    %135 = arith.subf %134, %133 : vector<32x2xf32>
    %136 = vector.extract_strided_slice %107 {offsets = [0, 0], sizes = [32, 128], strides = [1, 1]} : vector<32x256xf32> to vector<32x128xf32>
    %137 = vector.extract_strided_slice %132 {offsets = [0, 0], sizes = [32, 1], strides = [1, 1]} : vector<32x2xf32> to vector<32x1xf32>
    %138 = vector.broadcast %137 : vector<32x1xf32> to vector<32x128xf32>
    %139 = arith.mulf %136, %138 : vector<32x128xf32>
    %140 = vector.extract_strided_slice %135 {offsets = [0, 0], sizes = [32, 1], strides = [1, 1]} : vector<32x2xf32> to vector<32x1xf32>
    %141 = vector.broadcast %140 : vector<32x1xf32> to vector<32x128xf32>
    %142 = arith.addf %139, %141 : vector<32x128xf32>
    %143 = vector.extract_strided_slice %107 {offsets = [0, 128], sizes = [32, 128], strides = [1, 1]} : vector<32x256xf32> to vector<32x128xf32>
    %144 = vector.extract_strided_slice %132 {offsets = [0, 1], sizes = [32, 1], strides = [1, 1]} : vector<32x2xf32> to vector<32x1xf32>
    %145 = vector.broadcast %144 : vector<32x1xf32> to vector<32x128xf32>
    %146 = arith.mulf %143, %145 : vector<32x128xf32>
    %147 = vector.extract_strided_slice %135 {offsets = [0, 1], sizes = [32, 1], strides = [1, 1]} : vector<32x2xf32> to vector<32x1xf32>
    %148 = vector.broadcast %147 : vector<32x1xf32> to vector<32x128xf32>
    %149 = arith.addf %146, %148 : vector<32x128xf32>
    %150 = tpu.concatenate %142, %149 in 1 : vector<32x128xf32>, vector<32x128xf32> -> vector<32x256xf32>
    %cst_25 = arith.constant 0.000000e+00 : f32
    %151 = vector.broadcast %cst_25 : f32 to vector<32x256xf32>
    %152 = arith.maximumf %150, %151 : vector<32x256xf32>
    %153 = vector.extract_strided_slice %1 {offsets = [64, 0], sizes = [32, 32], strides = [1, 1]} : vector<192x32xf32> to vector<32x32xf32>
    %cst_26 = arith.constant dense<0.000000e+00> : vector<32x256xf32>
    %154 = tpu.matmul %153, %152, %cst_26 {dimension_numbers = #tpu.dot_dimension_numbers<[1], [0], [0], [1], [0, 0, 1, 1], [], []>} : vector<32x32xf32>, vector<32x256xf32>, vector<32x256xf32> -> vector<32x256xf32>
    %155 = arith.addf %107, %154 : vector<32x256xf32>
    %156 = vector.extract_strided_slice %3 {offsets = [0, 18], sizes = [32, 1], strides = [1, 1]} : vector<32x32xf32> to vector<32x1xf32>
    %157 = vector.broadcast %156 : vector<32x1xf32> to vector<32x256xf32>
    %158 = arith.addf %155, %157 : vector<32x256xf32>
    %159 = vector.extract_strided_slice %3 {offsets = [0, 11], sizes = [32, 1], strides = [1, 1]} : vector<32x32xf32> to vector<32x1xf32>
    %160 = vector.extract_strided_slice %3 {offsets = [0, 15], sizes = [32, 1], strides = [1, 1]} : vector<32x32xf32> to vector<32x1xf32>
    %161 = vector.extract_strided_slice %158 {offsets = [0, 0], sizes = [32, 128], strides = [1, 1]} : vector<32x256xf32> to vector<32x128xf32>
    %cst_27 = arith.constant dense<0.000000e+00> : vector<32xf32>
    %162 = vector.multi_reduction <add>, %161, %cst_27 [1] : vector<32x128xf32> to vector<32xf32>
    %163 = vector.shape_cast %162 : vector<32xf32> to vector<32x1xf32>
    %164 = arith.mulf %161, %161 : vector<32x128xf32>
    %cst_28 = arith.constant dense<0.000000e+00> : vector<32xf32>
    %165 = vector.multi_reduction <add>, %164, %cst_28 [1] : vector<32x128xf32> to vector<32xf32>
    %166 = vector.shape_cast %165 : vector<32xf32> to vector<32x1xf32>
    %167 = vector.extract_strided_slice %158 {offsets = [0, 128], sizes = [32, 128], strides = [1, 1]} : vector<32x256xf32> to vector<32x128xf32>
    %cst_29 = arith.constant dense<0.000000e+00> : vector<32xf32>
    %168 = vector.multi_reduction <add>, %167, %cst_29 [1] : vector<32x128xf32> to vector<32xf32>
    %169 = vector.shape_cast %168 : vector<32xf32> to vector<32x1xf32>
    %170 = arith.mulf %167, %167 : vector<32x128xf32>
    %cst_30 = arith.constant dense<0.000000e+00> : vector<32xf32>
    %171 = vector.multi_reduction <add>, %170, %cst_30 [1] : vector<32x128xf32> to vector<32xf32>
    %172 = vector.shape_cast %171 : vector<32xf32> to vector<32x1xf32>
    %173 = tpu.concatenate %163, %169, %166, %172 in 1 : vector<32x1xf32>, vector<32x1xf32>, vector<32x1xf32>, vector<32x1xf32> -> vector<32x4xf32>
    %cst_31 = arith.constant dense<0.000000e+00> : vector<32x4xf32>
    %174 = tpu.matmul %2, %173, %cst_31 {dimension_numbers = #tpu.dot_dimension_numbers<[1], [0], [0], [1], [0, 0, 1, 1], [], []>} : vector<32x32xf32>, vector<32x4xf32>, vector<32x4xf32> -> vector<32x4xf32>
    %175 = vector.extract_strided_slice %174 {offsets = [0, 0], sizes = [32, 2], strides = [1, 1]} : vector<32x4xf32> to vector<32x2xf32>
    %176 = vector.extract_strided_slice %174 {offsets = [0, 2], sizes = [32, 2], strides = [1, 1]} : vector<32x4xf32> to vector<32x2xf32>
    %177 = arith.mulf %175, %175 : vector<32x2xf32>
    %178 = arith.subf %176, %177 : vector<32x2xf32>
    %cst_32 = arith.constant 9.99999974E-6 : f32
    %179 = vector.broadcast %cst_32 : f32 to vector<32x2xf32>
    %180 = arith.addf %178, %179 : vector<32x2xf32>
    %181 = math.rsqrt %180 : vector<32x2xf32>
    %182 = vector.broadcast %159 : vector<32x1xf32> to vector<32x2xf32>
    %183 = arith.mulf %182, %181 : vector<32x2xf32>
    %184 = arith.mulf %175, %183 : vector<32x2xf32>
    %185 = vector.broadcast %160 : vector<32x1xf32> to vector<32x2xf32>
    %186 = arith.subf %185, %184 : vector<32x2xf32>
    %187 = vector.extract_strided_slice %158 {offsets = [0, 0], sizes = [32, 128], strides = [1, 1]} : vector<32x256xf32> to vector<32x128xf32>
    %188 = vector.extract_strided_slice %183 {offsets = [0, 0], sizes = [32, 1], strides = [1, 1]} : vector<32x2xf32> to vector<32x1xf32>
    %189 = vector.broadcast %188 : vector<32x1xf32> to vector<32x128xf32>
    %190 = arith.mulf %187, %189 : vector<32x128xf32>
    %191 = vector.extract_strided_slice %186 {offsets = [0, 0], sizes = [32, 1], strides = [1, 1]} : vector<32x2xf32> to vector<32x1xf32>
    %192 = vector.broadcast %191 : vector<32x1xf32> to vector<32x128xf32>
    %193 = arith.addf %190, %192 : vector<32x128xf32>
    %194 = vector.extract_strided_slice %158 {offsets = [0, 128], sizes = [32, 128], strides = [1, 1]} : vector<32x256xf32> to vector<32x128xf32>
    %195 = vector.extract_strided_slice %183 {offsets = [0, 1], sizes = [32, 1], strides = [1, 1]} : vector<32x2xf32> to vector<32x1xf32>
    %196 = vector.broadcast %195 : vector<32x1xf32> to vector<32x128xf32>
    %197 = arith.mulf %194, %196 : vector<32x128xf32>
    %198 = vector.extract_strided_slice %186 {offsets = [0, 1], sizes = [32, 1], strides = [1, 1]} : vector<32x2xf32> to vector<32x1xf32>
    %199 = vector.broadcast %198 : vector<32x1xf32> to vector<32x128xf32>
    %200 = arith.addf %197, %199 : vector<32x128xf32>
    %201 = tpu.concatenate %193, %200 in 1 : vector<32x128xf32>, vector<32x128xf32> -> vector<32x256xf32>
    %cst_33 = arith.constant 0.000000e+00 : f32
    %202 = vector.broadcast %cst_33 : f32 to vector<32x256xf32>
    %203 = arith.maximumf %201, %202 : vector<32x256xf32>
    %204 = vector.extract_strided_slice %1 {offsets = [96, 0], sizes = [32, 32], strides = [1, 1]} : vector<192x32xf32> to vector<32x32xf32>
    %cst_34 = arith.constant dense<0.000000e+00> : vector<32x256xf32>
    %205 = tpu.matmul %204, %203, %cst_34 {dimension_numbers = #tpu.dot_dimension_numbers<[1], [0], [0], [1], [0, 0, 1, 1], [], []>} : vector<32x32xf32>, vector<32x256xf32>, vector<32x256xf32> -> vector<32x256xf32>
    %206 = arith.addf %158, %205 : vector<32x256xf32>
    %207 = vector.extract_strided_slice %3 {offsets = [0, 19], sizes = [32, 1], strides = [1, 1]} : vector<32x32xf32> to vector<32x1xf32>
    %208 = vector.broadcast %207 : vector<32x1xf32> to vector<32x256xf32>
    %209 = arith.addf %206, %208 : vector<32x256xf32>
    %210 = vector.extract_strided_slice %3 {offsets = [0, 20], sizes = [32, 1], strides = [1, 1]} : vector<32x32xf32> to vector<32x1xf32>
    %211 = vector.extract_strided_slice %3 {offsets = [0, 21], sizes = [32, 1], strides = [1, 1]} : vector<32x32xf32> to vector<32x1xf32>
    %212 = vector.extract_strided_slice %209 {offsets = [0, 0], sizes = [32, 128], strides = [1, 1]} : vector<32x256xf32> to vector<32x128xf32>
    %cst_35 = arith.constant dense<0.000000e+00> : vector<32xf32>
    %213 = vector.multi_reduction <add>, %212, %cst_35 [1] : vector<32x128xf32> to vector<32xf32>
    %214 = vector.shape_cast %213 : vector<32xf32> to vector<32x1xf32>
    %215 = arith.mulf %212, %212 : vector<32x128xf32>
    %cst_36 = arith.constant dense<0.000000e+00> : vector<32xf32>
    %216 = vector.multi_reduction <add>, %215, %cst_36 [1] : vector<32x128xf32> to vector<32xf32>
    %217 = vector.shape_cast %216 : vector<32xf32> to vector<32x1xf32>
    %218 = vector.extract_strided_slice %209 {offsets = [0, 128], sizes = [32, 128], strides = [1, 1]} : vector<32x256xf32> to vector<32x128xf32>
    %cst_37 = arith.constant dense<0.000000e+00> : vector<32xf32>
    %219 = vector.multi_reduction <add>, %218, %cst_37 [1] : vector<32x128xf32> to vector<32xf32>
    %220 = vector.shape_cast %219 : vector<32xf32> to vector<32x1xf32>
    %221 = arith.mulf %218, %218 : vector<32x128xf32>
    %cst_38 = arith.constant dense<0.000000e+00> : vector<32xf32>
    %222 = vector.multi_reduction <add>, %221, %cst_38 [1] : vector<32x128xf32> to vector<32xf32>
    %223 = vector.shape_cast %222 : vector<32xf32> to vector<32x1xf32>
    %224 = tpu.concatenate %214, %220, %217, %223 in 1 : vector<32x1xf32>, vector<32x1xf32>, vector<32x1xf32>, vector<32x1xf32> -> vector<32x4xf32>
    %cst_39 = arith.constant dense<0.000000e+00> : vector<32x4xf32>
    %225 = tpu.matmul %2, %224, %cst_39 {dimension_numbers = #tpu.dot_dimension_numbers<[1], [0], [0], [1], [0, 0, 1, 1], [], []>} : vector<32x32xf32>, vector<32x4xf32>, vector<32x4xf32> -> vector<32x4xf32>
    %226 = vector.extract_strided_slice %225 {offsets = [0, 0], sizes = [32, 2], strides = [1, 1]} : vector<32x4xf32> to vector<32x2xf32>
    %227 = vector.extract_strided_slice %225 {offsets = [0, 2], sizes = [32, 2], strides = [1, 1]} : vector<32x4xf32> to vector<32x2xf32>
    %228 = arith.mulf %226, %226 : vector<32x2xf32>
    %229 = arith.subf %227, %228 : vector<32x2xf32>
    %cst_40 = arith.constant 9.99999974E-6 : f32
    %230 = vector.broadcast %cst_40 : f32 to vector<32x2xf32>
    %231 = arith.addf %229, %230 : vector<32x2xf32>
    %232 = math.rsqrt %231 : vector<32x2xf32>
    %233 = vector.broadcast %210 : vector<32x1xf32> to vector<32x2xf32>
    %234 = arith.mulf %233, %232 : vector<32x2xf32>
    %235 = arith.mulf %226, %234 : vector<32x2xf32>
    %236 = vector.broadcast %211 : vector<32x1xf32> to vector<32x2xf32>
    %237 = arith.subf %236, %235 : vector<32x2xf32>
    %238 = vector.extract_strided_slice %209 {offsets = [0, 0], sizes = [32, 128], strides = [1, 1]} : vector<32x256xf32> to vector<32x128xf32>
    %239 = vector.extract_strided_slice %234 {offsets = [0, 0], sizes = [32, 1], strides = [1, 1]} : vector<32x2xf32> to vector<32x1xf32>
    %240 = vector.broadcast %239 : vector<32x1xf32> to vector<32x128xf32>
    %241 = arith.mulf %238, %240 : vector<32x128xf32>
    %242 = vector.extract_strided_slice %237 {offsets = [0, 0], sizes = [32, 1], strides = [1, 1]} : vector<32x2xf32> to vector<32x1xf32>
    %243 = vector.broadcast %242 : vector<32x1xf32> to vector<32x128xf32>
    %244 = arith.addf %241, %243 : vector<32x128xf32>
    %245 = vector.extract_strided_slice %209 {offsets = [0, 128], sizes = [32, 128], strides = [1, 1]} : vector<32x256xf32> to vector<32x128xf32>
    %246 = vector.extract_strided_slice %234 {offsets = [0, 1], sizes = [32, 1], strides = [1, 1]} : vector<32x2xf32> to vector<32x1xf32>
    %247 = vector.broadcast %246 : vector<32x1xf32> to vector<32x128xf32>
    %248 = arith.mulf %245, %247 : vector<32x128xf32>
    %249 = vector.extract_strided_slice %237 {offsets = [0, 1], sizes = [32, 1], strides = [1, 1]} : vector<32x2xf32> to vector<32x1xf32>
    %250 = vector.broadcast %249 : vector<32x1xf32> to vector<32x128xf32>
    %251 = arith.addf %248, %250 : vector<32x128xf32>
    %252 = tpu.concatenate %244, %251 in 1 : vector<32x128xf32>, vector<32x128xf32> -> vector<32x256xf32>
    %cst_41 = arith.constant 0.000000e+00 : f32
    %253 = vector.broadcast %cst_41 : f32 to vector<32x256xf32>
    %254 = arith.maximumf %252, %253 : vector<32x256xf32>
    %255 = vector.extract_strided_slice %3 {offsets = [0, 22], sizes = [32, 1], strides = [1, 1]} : vector<32x32xf32> to vector<32x1xf32>
    %256 = vector.broadcast %255 : vector<32x1xf32> to vector<32x256xf32>
    %257 = arith.mulf %254, %256 : vector<32x256xf32>
    %cst_42 = arith.constant dense<0.000000e+00> : vector<256xf32>
    %258 = vector.multi_reduction <add>, %257, %cst_42 [0] : vector<32x256xf32> to vector<256xf32>
    %259 = vector.shape_cast %258 : vector<256xf32> to vector<1x256xf32>
    %260 = vector.extract_strided_slice %3 {offsets = [0, 23], sizes = [1, 1], strides = [1, 1]} : vector<32x32xf32> to vector<1x1xf32>
    %261 = vector.broadcast %260 : vector<1x1xf32> to vector<1x256xf32>
    %262 = arith.addf %259, %261 : vector<1x256xf32>
    %c0_43 = arith.constant 0 : index
    %c0_44 = arith.constant 0 : index
    %263 = vector.load %arg3[%c0_43, %c0_44] : memref<1x256xf32, #tpu.memory_space<vmem>>, vector<1x256xf32>
    tpu.vector_store %arg3[%c0_43, %c0_44], %262 {strides = array<i32>} : memref<1x256xf32, #tpu.memory_space<vmem>>, vector<1x256xf32>,
    return
  }
  func.func @transform_0(%arg0: i32) -> (i32, i32) {
    %c0_i32 = arith.constant 0 : i32
    %c0_i32_0 = arith.constant 0 : i32
    %c0_i32_1 = arith.constant 0 : i32
    return %c0_i32, %c0_i32_0 : i32, i32
  }
  func.func @transform_1(%arg0: i32) -> (i32, i32) {
    %c0_i32 = arith.constant 0 : i32
    %c0_i32_0 = arith.constant 0 : i32
    %c0_i32_1 = arith.constant 0 : i32
    return %c0_i32, %c0_i32_0 : i32, i32
  }
  func.func @transform_2(%arg0: i32) -> (i32, i32) {
    %c0_i32 = arith.constant 0 : i32
    %c0_i32_0 = arith.constant 0 : i32
    %c0_i32_1 = arith.constant 0 : i32
    return %c0_i32, %c0_i32_0 : i32, i32
  }
}

</mosaic_0001>

<bundles_post_ra>
// kernel: _forward_impl.1
= control target key start
LH: loop header
LB: loop body
LE: loop exit
PB: predicated region body
PF: predicated region fallthrough
CT: control target
= control target key end

     0   :  { %vm38_vm0 = vcmask 64512   ;;  %v2801_v3 = vmov 0.0   ;;  %s3707_s0 = inlined_call_operand.vmem [shape: f32[8,256], index: 0, kind: input, shape index: {}]   ;;  %s3708_s1 = inlined_call_operand.vmem [shape: f32[192,32], index: 1, kind: input, shape index: {}]   ;;  %s3709_s2 = inlined_call_operand.hbm [shape: f32[1,256], index: 2, kind: output, shape index: {}]  }
   0x1   :  { %v13_v0 = vld [vmem:[%s3707_s0 + $0x8] sm:$0xff]  ;;  %v12_v1 = vld [vmem:[%s3707_s0] sm:$0xff]  ;;  %115 = vmatprep.mubr.f32.mxu0 %v2801_v3 }
   0x2   :  { %v2850_v2 = vld [vmem:[%s3708_s1 + $0xa0] sm:$0xff]  ;;  %51 = vmatprep.subr.mxu0 %v13_v0 }
   0x3   :  { %52 = vmatpush1.msra.mxu0 %v12_v1 }
   0x4   :  { %7 = vsyncpa [#allocation3], 0  ;;  %2378 = vmatmul.mubr.msk.f32.vlgmr.msra.gmra.mrb[0].mxu0 %vm38_vm0, %v2850_v2  ;;  %v2858_v4 = vld [vmem:[%s3708_s1 + $0xa8] sm:$0xff]  ;;  %v2865_v5 = vld [vmem:[%s3708_s1 + $0xb0] sm:$0xff]  ;;  %vm195_vm1 = vcmask 261120   ;;  %vm180_vm2 = vcmask 7168  }
   0x5   :  { %121 = vmatprep.mubr.f32.mxu0 %v2801_v3  ;;  %v2872_v6 = vld [vmem:[%s3708_s1 + $0xb8] sm:$0xff]  ;;  %v2918_v23 = vld [vmem:[%s3708_s1 + $0x80] sm:$0xff]  ;;  %vm185_vm3 = vcmask 15360   ;;  %vm190_vm4 = vcmask 23552   ;;  %v2939_v54 = vld [vmem:[%s3708_s1 + $0x88] sm:$0xff]  ;;  %v2802_v57 = vmov 8  }
   0x6   :  { %2466 = vmatprep.mubr.msk.f32.mxu1 %vm195_vm1, %v2918_v23  ;;  %v2944_v55 = vld [vmem:[%s3708_s1 + $0x90] sm:$0xff]  ;;  %v2953_v56 = vld [vmem:[%s3708_s1 + $0x98] sm:$0xff]  ;;  %2625 = vset.pattern.permute.xlu0 %v2802_v57  ;;  %s2803_s28 = smov 2   ;;  %s2807_s29 = smov 126  }
   0x7   :  { %2626 = vset.pattern.permute.xlu1 %v2802_v57 }
   0x8   :  { %2379 = vmatmul.mubr.msk.f32.gmra.mrb[2].mxu0 %vm38_vm0, %v2858_v4 }
   0x9   :  { %127 = vmatprep.mubr.f32.mxu0 %v2801_v3 }
   0xc   :  { %2380 = vmatmul.mubr.msk.f32.gmra.mrb[4].mxu0 %vm38_vm0, %v2865_v5 }
   0xd   :  { %133 = vmatprep.mubr.f32.mxu0 %v2801_v3 }
  0x10   :  { %2381 = vmatmul.mubr.msk.f32.gmra.mrb[6].mxu0 %vm38_vm0, %v2872_v6 }
  0x11   :  { %2480 = vmatprep.mubr.msk.f32.mxu0 %vm195_vm1, %v2918_v23 }
  0xd7   :  { %v2875_v7 = vpop.f32.mrb[0].mxu0 }
  0xd8   :  { %140 = vadd.xlane.f32.xlu0 %v2875_v7  ;;  %v2878_v8 = vpop.f32.mrb[1].mxu0  ;;  %v148_v9 = vmul.f32 %v2875_v7, %v2875_v7 }
  0xd9   :  { %160 = vadd.xlane.f32.xlu1 %v2878_v8  ;;  %v168_v12 = vmul.f32 %v2878_v8, %v2878_v8 }
  0xdb   :  { %v2883_v10 = vpop.f32.mrb[2].mxu0 }
  0xdc   :  { %152 = vadd.xlane.f32.xlu0 %v148_v9  ;;  %v2885_v11 = vpop.f32.mrb[3].mxu0  ;;  %v149_v13 = vmul.f32 %v2883_v10, %v2883_v10  ;;  %v2804_v9 = vmov 12  }
  0xdd   :  { %162 = vadd.xlane.f32.xlu1 %v2885_v11  ;;  %v169_v16 = vmul.f32 %v2885_v11, %v2885_v11 }
  0xdf   :  { %v2892_v14 = vpop.f32.mrb[4].mxu0 }
  0xe0   :  { %172 = vadd.xlane.f32.xlu0 %v168_v12  ;;  %v2894_v15 = vpop.f32.mrb[5].mxu0  ;;  %v150_v19 = vmul.f32 %v2892_v14, %v2892_v14  ;;  %v2805_v12 = vmov 2  }
  0xe1   :  { %154 = vadd.xlane.f32.xlu1 %v149_v13  ;;  %v170_v21 = vmul.f32 %v2894_v15, %v2894_v15  ;;  %v2806_v13 = vmov 3  }
  0xe3   :  { %v2898_v17 = vpop.f32.mrb[6].mxu0 }
  0xe4   :  { %142 = vadd.xlane.f32.xlu0 %v2883_v10  ;;  %v2901_v18 = vpop.f32.mrb[7].mxu0  ;;  %v151_v20 = vmul.f32 %v2898_v17, %v2898_v17 }
  0xe5   :  { %174 = vadd.xlane.f32.xlu1 %v169_v16  ;;  %v171_v22 = vmul.f32 %v2901_v18, %v2901_v18 }
  0xe8   :  { %144 = vadd.xlane.f32.xlu0 %v2892_v14 }
  0xe9   :  { %146 = vadd.xlane.f32.xlu1 %v2898_v17 }
  0xec   :  { %164 = vadd.xlane.f32.xlu0 %v2894_v15 }
  0xed   :  { %166 = vadd.xlane.f32.xlu1 %v2901_v18 }
  0xf0   :  { %156 = vadd.xlane.f32.xlu0 %v150_v19 }
  0xf1   :  { %158 = vadd.xlane.f32.xlu1 %v151_v20 }
  0xf4   :  { %176 = vadd.xlane.f32.xlu0 %v170_v21 }
  0xf5   :  { %178 = vadd.xlane.f32.xlu1 %v171_v22 }
 0x165   :  { %v141_v24 = vpop.xlane.xlu0 %140 }
 0x166   :  { %v161_v25 = vpop.xlane.xlu1 %160 }
 0x167   :  { %v181_v31 = vsel %vm180_vm2, %v141_v24, %v161_v25 }
 0x169   :  { %v153_v26 = vpop.xlane.xlu0 %152 }
 0x16a   :  { %v163_v27 = vpop.xlane.xlu1 %162  ;;  %v186_v34 = vsel %vm185_vm3, %v181_v31, %v153_v26 }
 0x16d   :  { %v173_v28 = vpop.xlane.xlu0 %172 }
 0x16e   :  { %v155_v29 = vpop.xlane.xlu1 %154  ;;  %v191_v36 = vsel %vm190_vm4, %v186_v34, %v173_v28 }
 0x171   :  { %v143_v30 = vpop.xlane.xlu0 %142 }
 0x172   :  { %v182_v32 = vsel %vm180_vm2, %v143_v30, %v163_v27  ;;  %v175_v33 = vpop.xlane.xlu1 %174 }
 0x173   :  { %v187_v35 = vsel %vm185_vm3, %v182_v32, %v155_v29 }
 0x174   :  { %v192_v37 = vsel %vm190_vm4, %v187_v35, %v175_v33 }
 0x175   :  { %v145_v38 = vpop.xlane.xlu0 %144  ;;  %v2528_v39 = vpack.c.bf16 %v192_v37, %v191_v36 }
 0x176   :  { %v147_v40 = vpop.xlane.xlu1 %146 }
 0x177   :  { %2529 = vmatprep.subr.bf16.mxu1 %v2528_v39 }
 0x178   :  { %2531 = vmatpush3.bf16.msra.mxu1 %v2528_v39 }
 0x179   :  { %v165_v41 = vpop.xlane.xlu0 %164 }
 0x17a   :  { %v167_v42 = vpop.xlane.xlu1 %166  ;;  %v183_v45 = vsel %vm180_vm2, %v145_v38, %v165_v41 }
 0x17b   :  { %v184_v46 = vsel %vm180_vm2, %v147_v40, %v167_v42 }
 0x17d   :  { %v157_v43 = vpop.xlane.xlu0 %156 }
 0x17e   :  { %v159_v44 = vpop.xlane.xlu1 %158  ;;  %v188_v47 = vsel %vm185_vm3, %v183_v45, %v157_v43  ;;  %v2808_v43 = vmov 0  }
 0x17f   :  { %v189_v49 = vsel %vm185_vm3, %v184_v46, %v159_v44  ;;  %v2809_v44 = vmov 1  }
 0x181   :  { %v177_v48 = vpop.xlane.xlu0 %176 }
 0x182   :  { %v193_v50 = vsel %vm190_vm4, %v188_v47, %v177_v48  ;;  %v179_v51 = vpop.xlane.xlu1 %178 }
 0x183   :  { %v194_v52 = vsel %vm190_vm4, %v189_v49, %v179_v51 }
 0x184   :  { %v2532_v53 = vpack.c.bf16 %v194_v52, %v193_v50 }
 0x186   :  { %2533 = vmatprep.subr.bf16.mxu1 %v2532_v53 }
 0x187   :  { %2535 = vmatpush3.bf16.msra.mxu1 %v2532_v53 }
 0x18a   :  { %2467 = vmatmul.mubr.msk.f32.vlgmr.msra.gmra.mrb[0].mxu1 %vm195_vm1, %v2939_v54 }
 0x18b   :  { %2469 = vmatprep.mubr.msk.f32.mxu1 %vm195_vm1, %v2944_v55 }
 0x18e   :  { %2470 = vmatmul.mubr.msk.f32.gmra.mrb[2].mxu1 %vm195_vm1, %v2953_v56 }
 0x18f   :  { %553 = vmatprep.mubr.f32.mxu1 %v2801_v3 }
 0x25d   :  { %v2958_v58 = vpop.f32.mrb[0].mxu1 }
 0x25e   :  { %v294_v59 = vmul.f32 %v2958_v58, %v2958_v58  ;;  %v2962_v60 = vpop.f32.mrb[1].mxu1 }
 0x25f   :  { %v293_v61 = vmul.f32 %v2962_v60, %v2962_v60 }
 0x260   :  { %303 = vrot.lane.b32.xlu1 %v294_v59, %s2803_s28 }
 0x261   :  { %301 = vrot.lane.b32.xlu0 %v293_v61, %s2803_s28  ;;  %v2968_v62 = vpop.f32.mrb[2].mxu1 }
 0x262   :  { %v296_v63 = vmul.f32 %v2968_v62, %v2968_v62  ;;  %v2972_v0 = vpop.f32.mrb[3].mxu1 }
 0x263   :  { %v295_v1 = vmul.f32 %v2972_v0, %v2972_v0 }
 0x264   :  { %307 = vrot.lane.b32.xlu1 %v296_v63, %s2803_s28 }
 0x265   :  { %326 = vperm.xlu0 %2625, %v2850_v2  }
 0x268   :  { %305 = vrot.lane.b32.xlu1 %v295_v1, %s2803_s28 }
 0x269   :  { %338 = vperm.xlu0 %2625, %v2872_v6  }
 0x26c   :  { %330 = vperm.xlu1 %2626, %v2858_v4  }
 0x26d   :  { %2628 = vset.pattern.permute.xlu0 %v2804_v9 }
 0x26e   :  { %370 = vperm.xlu0 %2628, %v2858_v4  }
 0x270   :  { %334 = vperm.xlu1 %2626, %v2865_v5  }
 0x272   :  { %2631 = vset.pattern.permute.xlu0 %v2805_v12 }
 0x274   :  { %2627 = vset.pattern.permute.xlu1 %v2804_v9 }
 0x275   :  { %366 = vperm.xlu1 %2627, %v2850_v2  }
 0x279   :  { %374 = vperm.xlu1 %2627, %v2865_v5  }
 0x27d   :  { %378 = vperm.xlu1 %2627, %v2872_v6  }
 0x281   :  { %2629 = vset.pattern.permute.xlu1 %v2806_v13 }
 0x2d2   :  { %v304_v16 = vpop.permute.xlu1 %303 }
 0x2d3   :  { %v302_v19 = vpop.permute.xlu0 %301  ;;  %v314_v24 = vsub.f32 %v2958_v58, %v304_v16 }
 0x2d4   :  { %v313_v20 = vsub.f32 %v2962_v60, %v302_v19 }
 0x2d5   :  { %v318_v27 = vadd.f32 1e-05, %v314_v24 }
 0x2d6   :  { %v317_v21 = vadd.f32 1e-05, %v313_v20  ;;  %v308_v22 = vpop.permute.xlu1 %307 }
 0x2d7   :  { %v316_v26 = vsub.f32 %v2968_v62, %v308_v22 }
 0x2d8   :  { %2722 = vrsqrt.f32 %v317_v21 }
 0x2d9   :  { %v320_v29 = vadd.f32 1e-05, %v316_v26  ;;  %2724 = vrsqrt.f32 %v318_v27 }
 0x2da   :  { %v306_v25 = vpop.permute.xlu1 %305 }
 0x2db   :  { %v315_v28 = vsub.f32 %v2972_v0, %v306_v25  ;;  %2726 = vrsqrt.f32 %v320_v29 }
 0x2dd   :  { %v319_v30 = vadd.f32 1e-05, %v315_v28 }
 0x2df   :  { %2728 = vrsqrt.f32 %v319_v30 }
 0x2e2   :  { %v2723_v31 = vpop.eup %2722 }
 0x2e3   :  { %v2725_v34 = vpop.eup %2724 }
 0x2e4   :  { %v327_v32 = vpop.permute.xlu0 %326 }
 0x2e5   :  { %v341_v33 = vmul.f32 %v2723_v31, %v327_v32  ;;  %v2727_v38 = vpop.eup %2726 }
 0x2e7   :  { %349 = vrot.lane.b32.xlu0 %v341_v33, %s2807_s29 }
 0x2e8   :  { %v339_v37 = vpop.permute.xlu0 %338 }
 0x2e9   :  { %v2729_v39 = vpop.eup %2728  ;;  %v344_v41 = vmul.f32 %v2727_v38, %v339_v37 }
 0x2eb   :  { %v331_v35 = vpop.permute.xlu1 %330 }
 0x2ec   :  { %v342_v36 = vmul.f32 %v2725_v34, %v331_v35 }
 0x2ed   :  { %v371_v46 = vpop.permute.xlu0 %370 }
 0x2ee   :  { %351 = vrot.lane.b32.xlu1 %v342_v36, %s2807_s29 }
 0x2ef   :  { %v335_v40 = vpop.permute.xlu1 %334 }
 0x2f0   :  { %v343_v42 = vmul.f32 %v2729_v39, %v335_v40 }
 0x2f2   :  { %355 = vrot.lane.b32.xlu1 %v344_v41, %s2807_s29  ;;  %353 = vrot.lane.b32.xlu0 %v343_v42, %s2807_s29 }
 0x2f4   :  { %v367_v45 = vpop.permute.xlu1 %366 }
 0x2f6   :  { %434 = vperm.xlu1 %2629, %v342_v36   ;;  %390 = vperm.xlu0 %2631, %v342_v36  }
 0x2f8   :  { %v375_v47 = vpop.permute.xlu1 %374 }
 0x2fa   :  { %2630 = vset.pattern.permute.xlu1 %v2805_v12  ;;  %2632 = vset.pattern.permute.xlu0 %v2806_v13 }
 0x2fb   :  { %386 = vperm.xlu1 %2630, %v341_v33   ;;  %430 = vperm.xlu0 %2632, %v341_v33  }
 0x2fc   :  { %v379_v50 = vpop.permute.xlu1 %378 }
 0x2ff   :  { %398 = vperm.xlu1 %2630, %v344_v41   ;;  %442 = vperm.xlu0 %2632, %v344_v41  }
 0x303   :  { %2633 = vset.pattern.permute.xlu1 %v2806_v13  ;;  %2638 = vset.pattern.permute.xlu0 %v2808_v43 }
 0x304   :  { %438 = vperm.xlu1 %2633, %v343_v42  }
 0x308   :  { %2634 = vset.pattern.permute.xlu1 %v2805_v12 }
 0x309   :  { %394 = vperm.xlu1 %2634, %v343_v42  }
 0x30d   :  { %2635 = vset.pattern.permute.xlu1 %v2809_v44 }
 0x359   :  { %v350_v48 = vpop.permute.xlu0 %349 }
 0x35a   :  { %v361_v49 = vmul.f32 %v350_v48, %v2962_v60 }
 0x35c   :  { %v381_v51 = vsub.f32 %v367_v45, %v361_v49 }
 0x35e   :  { %407 = vperm.xlu0 %2638, %v381_v51  }
 0x360   :  { %v352_v52 = vpop.permute.xlu1 %351 }
 0x361   :  { %v362_v53 = vmul.f32 %v2958_v58, %v352_v52  ;;  %v2810_v58 = vmov 16  }
 0x362   :  { %2639 = vset.pattern.permute.xlu0 %v2809_v44 }
 0x363   :  { %v382_v57 = vsub.f32 %v371_v46, %v362_v53 }
 0x364   :  { %v354_v59 = vpop.permute.xlu0 %353  ;;  %v356_v63 = vpop.permute.xlu1 %355 }
 0x365   :  { %v363_v61 = vmul.f32 %v354_v59, %v2972_v0  ;;  %454 = vperm.xlu1 %2635, %v382_v57   ;;  %v364_v9 = vmul.f32 %v2968_v62, %v356_v63 }
 0x367   :  { %v383_v1 = vsub.f32 %v375_v47, %v363_v61  ;;  %v384_v60 = vsub.f32 %v379_v50, %v364_v9 }
 0x369   :  { %458 = vperm.xlu0 %2639, %v383_v1   ;;  %2636 = vset.pattern.permute.xlu1 %v2808_v43 }
 0x36a   :  { %412 = vperm.xlu1 %2636, %v382_v57  }
 0x36d   :  { %2641 = vset.pattern.permute.xlu0 %v2808_v43 }
 0x36e   :  { %2637 = vset.pattern.permute.xlu1 %v2809_v44  ;;  %422 = vperm.xlu0 %2641, %v384_v60  }
 0x36f   :  { %450 = vperm.xlu1 %2637, %v381_v51  }
 0x372   :  { %2643 = vset.pattern.permute.xlu0 %v2810_v58 }
 0x373   :  { %462 = vperm.xlu1 %2637, %v384_v60   ;;  %595 = vperm.xlu0 %2643, %v2865_v5  }
 0x375   :  { %v435_v62 = vpop.permute.xlu1 %434  ;;  %v391_v19 = vpop.permute.xlu0 %390 }
 0x376   :  { %v402_v28 = vmul.f32 %v391_v19, %v2883_v10  ;;  %v446_v32 = vmul.f32 %v435_v62, %v2885_v11  ;;  %v16_v19 = vld [vmem:[%s3708_s1 + $0x10] sm:$0xff] }
 0x377   :  { %2640 = vset.pattern.permute.xlu1 %v2808_v43 }
 0x378   :  { %417 = vperm.xlu1 %2640, %v383_v1  }
 0x37a   :  { %v387_v0 = vpop.permute.xlu1 %386  ;;  %v431_v21 = vpop.permute.xlu0 %430 }
 0x37b   :  { %v401_v27 = vmul.f32 %v387_v0, %v2875_v7  ;;  %v445_v35 = vmul.f32 %v431_v21, %v2878_v8  ;;  %v14_v0 = vld [vmem:[%s3708_s1] sm:$0xff] }
 0x37c   :  { %2642 = vset.pattern.permute.xlu1 %v2810_v58 }
 0x37d   :  { %587 = vperm.xlu1 %2642, %v2850_v2  }
 0x37e   :  { %v399_v16 = vpop.permute.xlu1 %398  ;;  %v443_v24 = vpop.permute.xlu0 %442 }
 0x37f   :  { %v448_v42 = vmul.f32 %v443_v24, %v2901_v18  ;;  %v404_v52 = vmul.f32 %v399_v16, %v2898_v17  ;;  %v15_v16 = vld [vmem:[%s3708_s1 + $0x8] sm:$0xff] }
 0x381   :  { %591 = vperm.xlu1 %2642, %v2858_v4  }
 0x383   :  { %v439_v20 = vpop.permute.xlu1 %438 }
 0x384   :  { %v447_v40 = vmul.f32 %v439_v20, %v2894_v15  ;;  %v17_v20 = vld [vmem:[%s3708_s1 + $0x18] sm:$0xff] }
 0x385   :  { %599 = vperm.xlu1 %2642, %v2872_v6  }
 0x388   :  { %v395_v22 = vpop.permute.xlu1 %394 }
 0x389   :  { %v403_v59 = vmul.f32 %v395_v22, %v2892_v14 }
 0x3dd   :  { %v408_v26 = vpop.permute.xlu0 %407 }
 0x3de   :  { %v425_v29 = vadd.f32 %v408_v26, %v401_v27 }
 0x3e0   :  { %v469_v33 = vmax.f32 %v425_v29, 0.0 }
 0x3e4   :  { %v455_v25 = vpop.permute.xlu1 %454 }
 0x3e5   :  { %v466_v36 = vadd.f32 %v455_v25, %v446_v32 }
 0x3e7   :  { %v472_v45 = vmax.f32 %v466_v36, 0.0 }
 0x3e8   :  { %v459_v37 = vpop.permute.xlu0 %458 }
 0x3e9   :  { %v413_v30 = vpop.permute.xlu1 %412  ;;  %v467_v46 = vadd.f32 %v459_v37, %v447_v40 }
 0x3ea   :  { %v426_v31 = vadd.f32 %v413_v30, %v402_v28 }
 0x3eb   :  { %v474_v53 = vmax.f32 %v467_v46, 0.0 }
 0x3ec   :  { %v471_v34 = vmax.f32 %v426_v31, 0.0 }
 0x3ed   :  { %v423_v49 = vpop.permute.xlu0 %422 }
 0x3ee   :  { %v2538_v38 = vpack.c.bf16 %v471_v34, %v469_v33  ;;  %v451_v39 = vpop.permute.xlu1 %450  ;;  %v428_v61 = vadd.f32 %v423_v49, %v404_v52  ;;  %v2811_v52 = vmov 9  }
 0x3ef   :  { %v465_v41 = vadd.f32 %v451_v39, %v445_v35  ;;  %2644 = vset.pattern.permute.xlu1 %v2811_v52  ;;  %2645 = vset.pattern.permute.xlu0 %v2811_v52 }
 0x3f0   :  { %v475_v60 = vmax.f32 %v428_v61, 0.0 }
 0x3f1   :  { %v470_v47 = vmax.f32 %v465_v41, 0.0 }
 0x3f2   :  { %v463_v48 = vpop.permute.xlu1 %462 }
 0x3f3   :  { %v468_v50 = vadd.f32 %v463_v48, %v448_v42  ;;  %v2536_v51 = vpack.c.bf16 %v472_v45, %v470_v47 }
 0x3f5   :  { %v476_v57 = vmax.f32 %v468_v50, 0.0  ;;  %2537 = vmatprep.subr.bf16.mxu1 %v2536_v51 }
 0x3f6   :  { %2539 = vmatpush1.bf16.msra.mxu1 %v2538_v38  ;;  %v596_v38 = vpop.permute.xlu0 %595 }
 0x3f7   :  { %v418_v63 = vpop.permute.xlu1 %417  ;;  %v2540_v1 = vpack.c.bf16 %v476_v57, %v474_v53 }
 0x3f8   :  { %v427_v9 = vadd.f32 %v418_v63, %v403_v59 }
 0x3f9   :  { %2541 = vmatprep.subr.bf16.mxu1 %v2540_v1 }
 0x3fa   :  { %v473_v58 = vmax.f32 %v427_v9, 0.0 }
 0x3fc   :  { %v2542_v62 = vpack.c.bf16 %v475_v60, %v473_v58  ;;  %v588_v21 = vpop.permute.xlu1 %587 }
 0x3fe   :  { %2543 = vmatpush1.bf16.msra.mxu1 %v2542_v62 }
 0x400   :  { %v592_v32 = vpop.permute.xlu1 %591 }
 0x401   :  { %2386 = vmatmul.mubr.msk.f32.vlgmr.msra.gmra.mrb[4].mxu1 %vm195_vm1, %v14_v0 }
 0x402   :  { %559 = vmatprep.mubr.f32.mxu1 %v2801_v3 }
 0x405   :  { %2387 = vmatmul.mubr.msk.f32.gmra.mrb[6].mxu1 %vm195_vm1, %v15_v16 }
 0x406   :  { %565 = vmatprep.mubr.f32.mxu1 %v2801_v3 }
 0x409   :  { %2388 = vmatmul.mubr.msk.f32.gmra.mrb[8].mxu1 %vm195_vm1, %v16_v19 }
 0x40a   :  { %571 = vmatprep.mubr.f32.mxu1 %v2801_v3 }
 0x40d   :  { %2389 = vmatmul.mubr.msk.f32.gmra.mrb[10].mxu1 %vm195_vm1, %v17_v20 }
 0x40e   :  { %2494 = vmatprep.mubr.msk.f32.mxu1 %vm195_vm1, %v2918_v23 }
 0x4d4   :  { %v555_v22 = vpop.f32.mrb[4].mxu1 }
 0x4d5   :  { %v578_v24 = vadd.f32 %v555_v22, %v2875_v7  ;;  %v557_v25 = vpop.f32.mrb[5].mxu1 }
 0x4d6   :  { %v579_v26 = vadd.f32 %v557_v25, %v2878_v8 }
 0x4d7   :  { %v3046_v27 = vadd.f32 %v588_v21, %v578_v24 }
 0x4d8   :  { %v3048_v28 = vadd.f32 %v588_v21, %v579_v26  ;;  %v561_v29 = vpop.f32.mrb[6].mxu1 }
 0x4d9   :  { %v580_v30 = vadd.f32 %v561_v29, %v2883_v10  ;;  %v563_v31 = vpop.f32.mrb[7].mxu1  ;;  %610 = vadd.xlane.f32.xlu1 %v3046_v27  ;;  %v618_v7 = vmul.f32 %v3046_v27, %v3046_v27 }
 0x4da   :  { %v581_v33 = vadd.f32 %v563_v31, %v2885_v11  ;;  %630 = vadd.xlane.f32.xlu0 %v3048_v28  ;;  %v638_v37 = vmul.f32 %v3048_v28, %v3048_v28 }
 0x4db   :  { %v3054_v34 = vadd.f32 %v592_v32, %v580_v30 }
 0x4dc   :  { %v567_v8 = vpop.f32.mrb[8].mxu1  ;;  %v3063_v11 = vadd.f32 %v592_v32, %v581_v33 }
 0x4dd   :  { %v582_v35 = vadd.f32 %v567_v8, %v2892_v14  ;;  %v569_v36 = vpop.f32.mrb[9].mxu1  ;;  %622 = vadd.xlane.f32.xlu1 %v618_v7 }
 0x4de   :  { %v583_v10 = vadd.f32 %v569_v36, %v2894_v15  ;;  %612 = vadd.xlane.f32.xlu0 %v3054_v34  ;;  %v619_v15 = vmul.f32 %v3054_v34, %v3054_v34  ;;  %v639_v46 = vmul.f32 %v3063_v11, %v3063_v11 }
 0x4df   :  { %v3068_v14 = vadd.f32 %v596_v38, %v582_v35 }
 0x4e0   :  { %v573_v39 = vpop.f32.mrb[10].mxu1  ;;  %v3073_v45 = vadd.f32 %v596_v38, %v583_v10 }
 0x4e1   :  { %v584_v40 = vadd.f32 %v573_v39, %v2898_v17  ;;  %v575_v41 = vpop.f32.mrb[11].mxu1  ;;  %642 = vadd.xlane.f32.xlu1 %v638_v37  ;;  %v600_v17 = vpop.permute.xlu1 %599 }
 0x4e2   :  { %v585_v42 = vadd.f32 %v575_v41, %v2901_v18  ;;  %632 = vadd.xlane.f32.xlu0 %v3063_v11  ;;  %v620_v18 = vmul.f32 %v3068_v14, %v3068_v14  ;;  %v640_v48 = vmul.f32 %v3073_v45, %v3073_v45 }
 0x4e3   :  { %v3080_v47 = vadd.f32 %v600_v17, %v584_v40 }
 0x4e4   :  { %v3085_v49 = vadd.f32 %v600_v17, %v585_v42 }
 0x4e5   :  { %614 = vadd.xlane.f32.xlu1 %v3068_v14  ;;  %v621_v50 = vmul.f32 %v3080_v47, %v3080_v47 }
 0x4e6   :  { %624 = vadd.xlane.f32.xlu0 %v619_v15  ;;  %v641_v51 = vmul.f32 %v3085_v49, %v3085_v49  ;;  %v2812_v15 = vmov 13  }
 0x4e9   :  { %634 = vadd.xlane.f32.xlu1 %v3073_v45 }
 0x4ea   :  { %644 = vadd.xlane.f32.xlu0 %v639_v46 }
 0x4ed   :  { %626 = vadd.xlane.f32.xlu1 %v620_v18 }
 0x4ee   :  { %616 = vadd.xlane.f32.xlu0 %v3080_v47 }
 0x4f1   :  { %646 = vadd.xlane.f32.xlu1 %v640_v48 }
 0x4f2   :  { %636 = vadd.xlane.f32.xlu0 %v3085_v49 }
 0x4f6   :  { %628 = vadd.xlane.f32.xlu0 %v621_v50 }
 0x4fa   :  { %648 = vadd.xlane.f32.xlu0 %v641_v51 }
 0x502   :  { %780 = vperm.xlu1 %2644, %v2850_v2  }
 0x566   :  { %v611_v53 = vpop.xlane.xlu1 %610 }
 0x567   :  { %v631_v57 = vpop.xlane.xlu0 %630 }
 0x568   :  { %v650_v58 = vsel %vm180_vm2, %v611_v53, %v631_v57 }
 0x56a   :  { %v623_v59 = vpop.xlane.xlu1 %622 }
 0x56b   :  { %v613_v61 = vpop.xlane.xlu0 %612  ;;  %v654_v0 = vsel %vm185_vm3, %v650_v58, %v623_v59 }
 0x56e   :  { %v643_v63 = vpop.xlane.xlu1 %642 }
 0x56f   :  { %v633_v1 = vpop.xlane.xlu0 %632  ;;  %v658_v20 = vsel %vm190_vm4, %v654_v0, %v643_v63 }
 0x570   :  { %v651_v62 = vsel %vm180_vm2, %v613_v61, %v633_v1 }
 0x572   :  { %v615_v9 = vpop.xlane.xlu1 %614 }
 0x573   :  { %v625_v60 = vpop.xlane.xlu0 %624 }
 0x574   :  { %v655_v16 = vsel %vm185_vm3, %v651_v62, %v625_v60 }
 0x576   :  { %v635_v22 = vpop.xlane.xlu1 %634 }
 0x577   :  { %v645_v19 = vpop.xlane.xlu0 %644  ;;  %v652_v32 = vsel %vm180_vm2, %v615_v9, %v635_v22 }
 0x578   :  { %v659_v21 = vsel %vm190_vm4, %v655_v16, %v645_v19 }
 0x579   :  { %v2544_v24 = vpack.c.bf16 %v659_v21, %v658_v20 }
 0x57a   :  { %v627_v26 = vpop.xlane.xlu1 %626 }
 0x57b   :  { %v617_v25 = vpop.xlane.xlu0 %616  ;;  %2545 = vmatprep.subr.bf16.mxu0 %v2544_v24  ;;  %v656_v7 = vsel %vm185_vm3, %v652_v32, %v627_v26 }
 0x57c   :  { %2547 = vmatpush3.bf16.msra.mxu0 %v2544_v24 }
 0x57e   :  { %v647_v31 = vpop.xlane.xlu1 %646 }
 0x57f   :  { %v637_v29 = vpop.xlane.xlu0 %636  ;;  %v660_v36 = vsel %vm190_vm4, %v656_v7, %v647_v31 }
 0x580   :  { %v653_v33 = vsel %vm180_vm2, %v617_v25, %v637_v29 }
 0x582   :  { %v781_v46 = vpop.permute.xlu1 %780 }
 0x583   :  { %v629_v30 = vpop.xlane.xlu0 %628 }
 0x584   :  { %v657_v8 = vsel %vm185_vm3, %v653_v33, %v629_v30 }
 0x587   :  { %v649_v35 = vpop.xlane.xlu0 %648 }
 0x588   :  { %v661_v10 = vsel %vm190_vm4, %v657_v8, %v649_v35 }
 0x589   :  { %v2548_v37 = vpack.c.bf16 %v661_v10, %v660_v36 }
 0x58b   :  { %2549 = vmatprep.subr.bf16.mxu0 %v2548_v37 }
 0x58c   :  { %2551 = vmatpush3.bf16.msra.mxu0 %v2548_v37 }
 0x58f   :  { %2481 = vmatmul.mubr.msk.f32.vlgmr.msra.gmra.mrb[8].mxu0 %vm195_vm1, %v2939_v54 }
 0x590   :  { %2483 = vmatprep.mubr.msk.f32.mxu0 %vm195_vm1, %v2944_v55 }
 0x593   :  { %2484 = vmatmul.mubr.msk.f32.gmra.mrb[10].mxu0 %vm195_vm1, %v2953_v56 }
 0x594   :  { %1007 = vmatprep.mubr.f32.mxu0 %v2801_v3 }
 0x662   :  { %v3112_v38 = vpop.f32.mrb[8].mxu0 }
 0x663   :  { %v748_v39 = vmul.f32 %v3112_v38, %v3112_v38  ;;  %v3116_v40 = vpop.f32.mrb[9].mxu0 }
 0x664   :  { %v747_v41 = vmul.f32 %v3116_v40, %v3116_v40 }
 0x665   :  { %757 = vrot.lane.b32.xlu0 %v748_v39, %s2803_s28 }
 0x666   :  { %755 = vrot.lane.b32.xlu1 %v747_v41, %s2803_s28  ;;  %v3122_v54 = vpop.f32.mrb[10].mxu0 }
 0x667   :  { %v750_v55 = vmul.f32 %v3122_v54, %v3122_v54  ;;  %v3126_v56 = vpop.f32.mrb[11].mxu0 }
 0x668   :  { %v749_v42 = vmul.f32 %v3126_v56, %v3126_v56 }
 0x669   :  { %784 = vperm.xlu0 %2645, %v2858_v4  }
 0x66a   :  { %761 = vrot.lane.b32.xlu1 %v750_v55, %s2803_s28 }
 0x66d   :  { %2646 = vset.pattern.permute.xlu0 %v2812_v15 }
 0x66e   :  { %759 = vrot.lane.b32.xlu1 %v749_v42, %s2803_s28  ;;  %820 = vperm.xlu0 %2646, %v2850_v2  }
 0x672   :  { %788 = vperm.xlu1 %2644, %v2865_v5   ;;  %832 = vperm.xlu0 %2646, %v2872_v6  }
 0x676   :  { %792 = vperm.xlu1 %2644, %v2872_v6   ;;  %2649 = vset.pattern.permute.xlu0 %v2806_v13 }
 0x67a   :  { %2647 = vset.pattern.permute.xlu1 %v2812_v15 }
 0x67b   :  { %824 = vperm.xlu1 %2647, %v2858_v4  }
 0x67f   :  { %828 = vperm.xlu1 %2647, %v2865_v5  }
 0x683   :  { %2648 = vset.pattern.permute.xlu1 %v2806_v13 }
 0x6d7   :  { %v758_v17 = vpop.permute.xlu0 %757 }
 0x6d8   :  { %v768_v18 = vsub.f32 %v3112_v38, %v758_v17  ;;  %v756_v48 = vpop.permute.xlu1 %755 }
 0x6d9   :  { %v767_v50 = vsub.f32 %v3116_v40, %v756_v48 }
 0x6da   :  { %v772_v51 = vadd.f32 1e-05, %v768_v18 }
 0x6db   :  { %v771_v52 = vadd.f32 1e-05, %v767_v50 }
 0x6dc   :  { %v762_v53 = vpop.permute.xlu1 %761 }
 0x6dd   :  { %2730 = vrsqrt.f32 %v771_v52  ;;  %v770_v61 = vsub.f32 %v3122_v54, %v762_v53 }
 0x6de   :  { %2732 = vrsqrt.f32 %v772_v51 }
 0x6df   :  { %v774_v9 = vadd.f32 1e-05, %v770_v61 }
 0x6e0   :  { %v760_v57 = vpop.permute.xlu1 %759 }
 0x6e1   :  { %v769_v59 = vsub.f32 %v3126_v56, %v760_v57 }
 0x6e3   :  { %v773_v63 = vadd.f32 1e-05, %v769_v59 }
 0x6e5   :  { %2734 = vrsqrt.f32 %v773_v63 }
 0x6e6   :  { %2736 = vrsqrt.f32 %v774_v9 }
 0x6e7   :  { %v2731_v1 = vpop.eup %2730 }
 0x6e8   :  { %v2733_v60 = vpop.eup %2732  ;;  %v785_v58 = vpop.permute.xlu0 %784  ;;  %v795_v62 = vmul.f32 %v2731_v1, %v781_v46 }
 0x6e9   :  { %v796_v0 = vmul.f32 %v2733_v60, %v785_v58 }
 0x6ea   :  { %803 = vrot.lane.b32.xlu1 %v795_v62, %s2807_s29 }
 0x6eb   :  { %805 = vrot.lane.b32.xlu0 %v796_v0, %s2807_s29 }
 0x6ed   :  { %v821_v26 = vpop.permute.xlu0 %820 }
 0x6ef   :  { %v2735_v16 = vpop.eup %2734 }
 0x6f0   :  { %v2737_v21 = vpop.eup %2736 }
 0x6f1   :  { %v789_v19 = vpop.permute.xlu1 %788  ;;  %v833_v30 = vpop.permute.xlu0 %832 }
 0x6f2   :  { %v797_v20 = vmul.f32 %v2735_v16, %v789_v19 }
 0x6f4   :  { %807 = vrot.lane.b32.xlu1 %v797_v20, %s2807_s29 }
 0x6f5   :  { %v793_v22 = vpop.permute.xlu1 %792 }
 0x6f6   :  { %v798_v24 = vmul.f32 %v2737_v21, %v793_v22 }
 0x6f8   :  { %884 = vperm.xlu1 %2648, %v795_v62   ;;  %809 = vrot.lane.b32.xlu0 %v798_v24, %s2807_s29 }
 0x6fa   :  { %v825_v25 = vpop.permute.xlu1 %824 }
 0x6fc   :  { %2650 = vset.pattern.permute.xlu1 %v2805_v12  ;;  %888 = vperm.xlu0 %2649, %v796_v0  }
 0x6fd   :  { %840 = vperm.xlu1 %2650, %v795_v62  }
 0x6fe   :  { %v829_v29 = vpop.permute.xlu1 %828 }
 0x700   :  { %2654 = vset.pattern.permute.xlu0 %v2805_v12 }
 0x701   :  { %844 = vperm.xlu1 %2650, %v796_v0   ;;  %848 = vperm.xlu0 %2654, %v797_v20  }
 0x705   :  { %2651 = vset.pattern.permute.xlu1 %v2806_v13  ;;  %2656 = vset.pattern.permute.xlu0 %v2808_v43 }
 0x706   :  { %896 = vperm.xlu1 %2651, %v798_v24  }
 0x70a   :  { %2652 = vset.pattern.permute.xlu1 %v2805_v12 }
 0x70b   :  { %852 = vperm.xlu1 %2652, %v798_v24  }
 0x70f   :  { %2653 = vset.pattern.permute.xlu1 %v2806_v13 }
 0x710   :  { %892 = vperm.xlu1 %2653, %v797_v20  }
 0x714   :  { %2655 = vset.pattern.permute.xlu1 %v2809_v44 }
 0x75c   :  { %v804_v32 = vpop.permute.xlu1 %803 }
 0x75d   :  { %v806_v31 = vpop.permute.xlu0 %805  ;;  %v815_v8 = vmul.f32 %v804_v32, %v3116_v40  ;;  %v2813_v40 = vmov 17  }
 0x75e   :  { %v816_v33 = vmul.f32 %v3112_v38, %v806_v31 }
 0x75f   :  { %v835_v35 = vsub.f32 %v821_v26, %v815_v8 }
 0x760   :  { %v836_v7 = vsub.f32 %v825_v25, %v816_v33 }
 0x762   :  { %866 = vperm.xlu0 %2656, %v836_v7   ;;  %908 = vperm.xlu1 %2655, %v836_v7  }
 0x766   :  { %2657 = vset.pattern.permute.xlu0 %v2809_v44  ;;  %2658 = vset.pattern.permute.xlu1 %v2808_v43  ;;  %v808_v36 = vpop.permute.xlu1 %807 }
 0x767   :  { %v817_v10 = vmul.f32 %v808_v36, %v3126_v56  ;;  %861 = vperm.xlu1 %2658, %v835_v35   ;;  %904 = vperm.xlu0 %2657, %v835_v35  }
 0x769   :  { %v837_v37 = vsub.f32 %v829_v29, %v817_v10  ;;  %v18_v10 = vld [vmem:[%s3708_s1 + $0x20] sm:$0xff] }
 0x76a   :  { %v810_v39 = vpop.permute.xlu0 %809 }
 0x76b   :  { %v818_v41 = vmul.f32 %v3122_v54, %v810_v39  ;;  %2659 = vset.pattern.permute.xlu1 %v2809_v44  ;;  %v20_v39 = vld [vmem:[%s3708_s1 + $0x30] sm:$0xff] }
 0x76c   :  { %912 = vperm.xlu1 %2659, %v837_v37  }
 0x76d   :  { %v838_v38 = vsub.f32 %v833_v30, %v818_v41  ;;  %v21_v41 = vld [vmem:[%s3708_s1 + $0x38] sm:$0xff] }
 0x76f   :  { %916 = vperm.xlu0 %2657, %v838_v38  }
 0x770   :  { %2660 = vset.pattern.permute.xlu1 %v2808_v43 }
 0x771   :  { %871 = vperm.xlu1 %2660, %v837_v37   ;;  %v19_v37 = vld [vmem:[%s3708_s1 + $0x28] sm:$0xff] }
 0x773   :  { %2661 = vset.pattern.permute.xlu0 %v2813_v40 }
 0x774   :  { %1041 = vperm.xlu0 %2661, %v2850_v2  }
 0x775   :  { %876 = vperm.xlu1 %2660, %v838_v38  }
 0x777   :  { %v885_v54 = vpop.permute.xlu1 %884 }
 0x778   :  { %1053 = vperm.xlu0 %2661, %v2872_v6  }
 0x779   :  { %2662 = vset.pattern.permute.xlu1 %v2813_v40 }
 0x77a   :  { %1045 = vperm.xlu1 %2662, %v2858_v4   ;;  %v899_v4 = vmul.f32 %v885_v54, %v3048_v28 }
 0x77b   :  { %v889_v15 = vpop.permute.xlu0 %888 }
 0x77c   :  { %v841_v55 = vpop.permute.xlu1 %840  ;;  %v900_v51 = vmul.f32 %v889_v15, %v3063_v11 }
 0x77d   :  { %v855_v6 = vmul.f32 %v841_v55, %v3046_v27 }
 0x77e   :  { %1049 = vperm.xlu1 %2662, %v2865_v5  }
 0x780   :  { %v845_v56 = vpop.permute.xlu1 %844  ;;  %v849_v17 = vpop.permute.xlu0 %848 }
 0x781   :  { %v856_v2 = vmul.f32 %v845_v56, %v3054_v34  ;;  %v857_v25 = vmul.f32 %v849_v17, %v3068_v14 }
 0x785   :  { %v897_v42 = vpop.permute.xlu1 %896 }
 0x786   :  { %v902_v19 = vmul.f32 %v897_v42, %v3085_v49 }
 0x78a   :  { %v853_v46 = vpop.permute.xlu1 %852 }
 0x78b   :  { %v858_v30 = vmul.f32 %v853_v46, %v3080_v47 }
 0x78f   :  { %v893_v18 = vpop.permute.xlu1 %892 }
 0x790   :  { %v901_v58 = vmul.f32 %v893_v18, %v3073_v45 }
 0x7e1   :  { %v867_v48 = vpop.permute.xlu0 %866  ;;  %v909_v50 = vpop.permute.xlu1 %908 }
 0x7e2   :  { %v880_v52 = vadd.f32 %v867_v48, %v856_v2  ;;  %v920_v5 = vadd.f32 %v909_v50, %v900_v51 }
 0x7e4   :  { %v925_v63 = vmax.f32 %v880_v52, 0.0  ;;  %v926_v1 = vmax.f32 %v920_v5, 0.0 }
 0x7e6   :  { %v905_v53 = vpop.permute.xlu0 %904  ;;  %v862_v57 = vpop.permute.xlu1 %861 }
 0x7e7   :  { %v919_v59 = vadd.f32 %v905_v53, %v899_v4  ;;  %v879_v61 = vadd.f32 %v862_v57, %v855_v6 }
 0x7e9   :  { %v924_v9 = vmax.f32 %v919_v59, 0.0  ;;  %v923_v60 = vmax.f32 %v879_v61, 0.0 }
 0x7eb   :  { %v2554_v62 = vpack.c.bf16 %v925_v63, %v923_v60  ;;  %v913_v0 = vpop.permute.xlu1 %912  ;;  %v2552_v16 = vpack.c.bf16 %v926_v1, %v924_v9 }
 0x7ec   :  { %v921_v20 = vadd.f32 %v913_v0, %v901_v58  ;;  %v3248_v0 = vld [vmem:[%s3708_s1 + $0xa0] sm:$0xff] }
 0x7ed   :  { %2553 = vmatprep.subr.bf16.mxu0 %v2552_v16 }
 0x7ee   :  { %v917_v21 = vpop.permute.xlu0 %916  ;;  %2555 = vmatpush1.bf16.msra.mxu0 %v2554_v62  ;;  %v928_v26 = vmax.f32 %v921_v20, 0.0 }
 0x7ef   :  { %v922_v22 = vadd.f32 %v917_v21, %v902_v19 }
 0x7f0   :  { %v872_v24 = vpop.permute.xlu1 %871 }
 0x7f1   :  { %v930_v29 = vmax.f32 %v922_v22, 0.0  ;;  %v881_v31 = vadd.f32 %v872_v24, %v857_v25 }
 0x7f3   :  { %v2556_v32 = vpack.c.bf16 %v930_v29, %v928_v26  ;;  %v927_v8 = vmax.f32 %v881_v31, 0.0  ;;  %v1042_v55 = vpop.permute.xlu0 %1041 }
 0x7f4   :  { %v877_v33 = vpop.permute.xlu1 %876 }
 0x7f5   :  { %v882_v7 = vadd.f32 %v877_v33, %v858_v30  ;;  %2557 = vmatprep.subr.bf16.mxu0 %v2556_v32 }
 0x7f7   :  { %v929_v35 = vmax.f32 %v882_v7, 0.0  ;;  %v1054_v63 = vpop.permute.xlu0 %1053 }
 0x7f9   :  { %v2558_v36 = vpack.c.bf16 %v929_v35, %v927_v8  ;;  %v1046_v48 = vpop.permute.xlu1 %1045 }
 0x7fb   :  { %2559 = vmatpush1.bf16.msra.mxu0 %v2558_v36 }
 0x7fd   :  { %v1050_v5 = vpop.permute.xlu1 %1049 }
 0x7fe   :  { %2394 = vmatmul.mubr.msk.f32.vlgmr.msra.gmra.mrb[12].mxu0 %vm195_vm1, %v18_v10 }
 0x7ff   :  { %1013 = vmatprep.mubr.f32.mxu0 %v2801_v3 }
 0x802   :  { %2395 = vmatmul.mubr.msk.f32.gmra.mrb[14].mxu0 %vm195_vm1, %v19_v37 }
 0x803   :  { %1019 = vmatprep.mubr.f32.mxu0 %v2801_v3 }
 0x806   :  { %2396 = vmatmul.mubr.msk.f32.gmra.mrb[16].mxu0 %vm195_vm1, %v20_v39 }
 0x807   :  { %1025 = vmatprep.mubr.f32.mxu0 %v2801_v3 }
 0x80a   :  { %2397 = vmatmul.mubr.msk.f32.gmra.mrb[18].mxu0 %vm195_vm1, %v21_v41 }
 0x80b   :  { %2508 = vmatprep.mubr.msk.f32.mxu0 %vm195_vm1, %v2918_v23 }
 0x8d1   :  { %v1009_v38 = vpop.f32.mrb[12].mxu0 }
 0x8d2   :  { %v1032_v40 = vadd.f32 %v1009_v38, %v3046_v27  ;;  %v1011_v54 = vpop.f32.mrb[13].mxu0 }
 0x8d3   :  { %v1033_v56 = vadd.f32 %v1011_v54, %v3048_v28 }
 0x8d4   :  { %v3199_v42 = vadd.f32 %v1042_v55, %v1032_v40 }
 0x8d5   :  { %v3201_v15 = vadd.f32 %v1042_v55, %v1033_v56  ;;  %v1015_v46 = vpop.f32.mrb[14].mxu0 }
 0x8d6   :  { %v1034_v17 = vadd.f32 %v1015_v46, %v3054_v34  ;;  %1064 = vadd.xlane.f32.xlu1 %v3199_v42  ;;  %v1017_v18 = vpop.f32.mrb[15].mxu0  ;;  %v1072_v27 = vmul.f32 %v3199_v42, %v3199_v42 }
 0x8d7   :  { %1084 = vadd.xlane.f32.xlu0 %v3201_v15  ;;  %v1035_v28 = vadd.f32 %v1017_v18, %v3063_v11  ;;  %v1092_v2 = vmul.f32 %v3201_v15, %v3201_v15 }
 0x8d8   :  { %v3206_v23 = vadd.f32 %v1046_v48, %v1034_v17 }
 0x8d9   :  { %v1021_v50 = vpop.f32.mrb[16].mxu0  ;;  %v3215_v4 = vadd.f32 %v1046_v48, %v1035_v28  ;;  %v3273_v28 = vld [vmem:[%s3708_s1 + $0x90] sm:$0xff] }
 0x8da   :  { %1076 = vadd.xlane.f32.xlu1 %v1072_v27  ;;  %v1023_v51 = vpop.f32.mrb[17].mxu0  ;;  %v1036_v34 = vadd.f32 %v1021_v50, %v3068_v14  ;;  %v1073_v57 = vmul.f32 %v3206_v23, %v3206_v23  ;;  %v3266_v27 = vld [vmem:[%s3708_s1 + $0x88] sm:$0xff]  ;;  %v3280_v50 = vld [vmem:[%s3708_s1 + $0x98] sm:$0xff] }
 0x8db   :  { %1066 = vadd.xlane.f32.xlu0 %v3206_v23  ;;  %v1037_v11 = vadd.f32 %v1023_v51, %v3073_v45  ;;  %v1093_v61 = vmul.f32 %v3215_v4, %v3215_v4 }
 0x8dc   :  { %v3218_v53 = vadd.f32 %v1050_v5, %v1036_v34 }
 0x8dd   :  { %v1027_v6 = vpop.f32.mrb[18].mxu0  ;;  %v3224_v14 = vadd.f32 %v1050_v5, %v1037_v11 }
 0x8de   :  { %1096 = vadd.xlane.f32.xlu1 %v1092_v2  ;;  %v1029_v52 = vpop.f32.mrb[19].mxu0  ;;  %v1038_v59 = vadd.f32 %v1027_v6, %v3080_v47  ;;  %v1074_v45 = vmul.f32 %v3218_v53, %v3218_v53 }
 0x8df   :  { %1086 = vadd.xlane.f32.xlu0 %v3215_v4  ;;  %v1039_v9 = vadd.f32 %v1029_v52, %v3085_v49  ;;  %v1094_v47 = vmul.f32 %v3224_v14, %v3224_v14  ;;  %v2814_v49 = vmov 10  }
 0x8e0   :  { %v3232_v1 = vadd.f32 %v1054_v63, %v1038_v59  ;;  %2663 = vset.pattern.permute.xlu1 %v2814_v49  ;;  %2664 = vset.pattern.permute.xlu0 %v2814_v49 }
 0x8e1   :  { %v3238_v60 = vadd.f32 %v1054_v63, %v1039_v9  ;;  %v3315_v63 = vld [vmem:[%s3708_s1 + $0xb0] sm:$0xff] }
 0x8e2   :  { %1068 = vadd.xlane.f32.xlu1 %v3218_v53  ;;  %v1075_v58 = vmul.f32 %v3232_v1, %v3232_v1 }
 0x8e3   :  { %1078 = vadd.xlane.f32.xlu0 %v1073_v57  ;;  %v1095_v62 = vmul.f32 %v3238_v60, %v3238_v60  ;;  %v3304_v57 = vld [vmem:[%s3708_s1 + $0xa8] sm:$0xff] }
 0x8e6   :  { %1088 = vadd.xlane.f32.xlu1 %v3224_v14 }
 0x8e7   :  { %1098 = vadd.xlane.f32.xlu0 %v1093_v61  ;;  %v2815_v61 = vmov 14  }
 0x8ea   :  { %1080 = vadd.xlane.f32.xlu1 %v1074_v45  ;;  %v3321_v45 = vld [vmem:[%s3708_s1 + $0xb8] sm:$0xff] }
 0x8eb   :  { %1070 = vadd.xlane.f32.xlu0 %v3232_v1 }
 0x8ee   :  { %1100 = vadd.xlane.f32.xlu1 %v1094_v47 }
 0x8ef   :  { %1090 = vadd.xlane.f32.xlu0 %v3238_v60 }
 0x8f3   :  { %1082 = vadd.xlane.f32.xlu0 %v1075_v58 }
 0x8f7   :  { %1102 = vadd.xlane.f32.xlu0 %v1095_v62 }
 0x8ff   :  { %1234 = vperm.xlu1 %2663, %v3248_v0  }
 0x963   :  { %v1065_v16 = vpop.xlane.xlu1 %1064 }
 0x964   :  { %v1085_v19 = vpop.xlane.xlu0 %1084 }
 0x965   :  { %v1104_v29 = vsel %vm180_vm2, %v1065_v16, %v1085_v19 }
 0x967   :  { %v1077_v20 = vpop.xlane.xlu1 %1076 }
 0x968   :  { %v1067_v21 = vpop.xlane.xlu0 %1066  ;;  %v1108_v31 = vsel %vm185_vm3, %v1104_v29, %v1077_v20 }
 0x96b   :  { %v1097_v22 = vpop.xlane.xlu1 %1096 }
 0x96c   :  { %v1087_v24 = vpop.xlane.xlu0 %1086  ;;  %v1112_v7 = vsel %vm190_vm4, %v1108_v31, %v1097_v22 }
 0x96d   :  { %v1105_v30 = vsel %vm180_vm2, %v1067_v21, %v1087_v24 }
 0x96f   :  { %v1069_v25 = vpop.xlane.xlu1 %1068 }
 0x970   :  { %v1079_v26 = vpop.xlane.xlu0 %1078 }
 0x971   :  { %v1109_v32 = vsel %vm185_vm3, %v1105_v30, %v1079_v26 }
 0x973   :  { %v1089_v35 = vpop.xlane.xlu1 %1088 }
 0x974   :  { %v1099_v33 = vpop.xlane.xlu0 %1098  ;;  %v1106_v40 = vsel %vm180_vm2, %v1069_v25, %v1089_v35 }
 0x975   :  { %v1113_v8 = vsel %vm190_vm4, %v1109_v32, %v1099_v33 }
 0x976   :  { %v2560_v36 = vpack.c.bf16 %v1113_v8, %v1112_v7 }
 0x977   :  { %v1081_v37 = vpop.xlane.xlu1 %1080 }
 0x978   :  { %v1071_v10 = vpop.xlane.xlu0 %1070  ;;  %2561 = vmatprep.subr.bf16.mxu1 %v2560_v36  ;;  %v1110_v55 = vsel %vm185_vm3, %v1106_v40, %v1081_v37 }
 0x979   :  { %2563 = vmatpush3.bf16.msra.mxu1 %v2560_v36 }
 0x97b   :  { %v1101_v38 = vpop.xlane.xlu1 %1100 }
 0x97c   :  { %v1091_v39 = vpop.xlane.xlu0 %1090  ;;  %v1114_v17 = vsel %vm190_vm4, %v1110_v55, %v1101_v38 }
 0x97d   :  { %v1107_v54 = vsel %vm180_vm2, %v1071_v10, %v1091_v39 }
 0x97f   :  { %v1235_v9 = vpop.permute.xlu1 %1234 }
 0x980   :  { %v1083_v41 = vpop.xlane.xlu0 %1082 }
 0x981   :  { %v1111_v56 = vsel %vm185_vm3, %v1107_v54, %v1083_v41 }
 0x984   :  { %v1103_v46 = vpop.xlane.xlu0 %1102 }
 0x985   :  { %v1115_v18 = vsel %vm190_vm4, %v1111_v56, %v1103_v46 }
 0x986   :  { %v2564_v48 = vpack.c.bf16 %v1115_v18, %v1114_v17 }
 0x988   :  { %2565 = vmatprep.subr.bf16.mxu1 %v2564_v48 }
 0x989   :  { %2567 = vmatpush3.bf16.msra.mxu1 %v2564_v48 }
 0x98c   :  { %2495 = vmatmul.mubr.msk.f32.vlgmr.msra.gmra.mrb[12].mxu1 %vm195_vm1, %v3266_v27 }
 0x98d   :  { %2497 = vmatprep.mubr.msk.f32.mxu1 %vm195_vm1, %v3273_v28 }
 0x990   :  { %2498 = vmatmul.mubr.msk.f32.gmra.mrb[14].mxu1 %vm195_vm1, %v3280_v50 }
 0x991   :  { %1461 = vmatprep.mubr.f32.mxu1 %v2801_v3 }
 0xa5f   :  { %v3285_v51 = vpop.f32.mrb[12].mxu1 }
 0xa60   :  { %v1202_v34 = vmul.f32 %v3285_v51, %v3285_v51  ;;  %v3289_v2 = vpop.f32.mrb[13].mxu1 }
 0xa61   :  { %v1201_v6 = vmul.f32 %v3289_v2, %v3289_v2 }
 0xa62   :  { %1211 = vrot.lane.b32.xlu0 %v1202_v34, %s2803_s28 }
 0xa63   :  { %1209 = vrot.lane.b32.xlu1 %v1201_v6, %s2803_s28  ;;  %v3295_v52 = vpop.f32.mrb[14].mxu1 }
 0xa64   :  { %v1204_v5 = vmul.f32 %v3295_v52, %v3295_v52  ;;  %v3299_v11 = vpop.f32.mrb[15].mxu1 }
 0xa65   :  { %v1203_v59 = vmul.f32 %v3299_v11, %v3299_v11 }
 0xa66   :  { %1238 = vperm.xlu0 %2664, %v3304_v57  }
 0xa67   :  { %1215 = vrot.lane.b32.xlu1 %v1204_v5, %s2803_s28 }
 0xa6a   :  { %2665 = vset.pattern.permute.xlu0 %v2815_v61 }
 0xa6b   :  { %1213 = vrot.lane.b32.xlu1 %v1203_v59, %s2803_s28  ;;  %1274 = vperm.xlu0 %2665, %v3248_v0  }
 0xa6f   :  { %1242 = vperm.xlu1 %2663, %v3315_v63   ;;  %1286 = vperm.xlu0 %2665, %v3321_v45  }
 0xa73   :  { %1246 = vperm.xlu1 %2663, %v3321_v45   ;;  %2668 = vset.pattern.permute.xlu0 %v2806_v13 }
 0xa77   :  { %2666 = vset.pattern.permute.xlu1 %v2815_v61 }
 0xa78   :  { %1278 = vperm.xlu1 %2666, %v3304_v57  }
 0xa7c   :  { %1282 = vperm.xlu1 %2666, %v3315_v63  }
 0xa80   :  { %2667 = vset.pattern.permute.xlu1 %v2806_v13 }
 0xad4   :  { %v1212_v47 = vpop.permute.xlu0 %1211 }
 0xad5   :  { %v1222_v58 = vsub.f32 %v3285_v51, %v1212_v47  ;;  %v1210_v62 = vpop.permute.xlu1 %1209 }
 0xad6   :  { %v1221_v49 = vsub.f32 %v3289_v2, %v1210_v62 }
 0xad7   :  { %v1226_v16 = vadd.f32 1e-05, %v1222_v58 }
 0xad8   :  { %v1225_v19 = vadd.f32 1e-05, %v1221_v49 }
 0xad9   :  { %v1216_v20 = vpop.permute.xlu1 %1215 }
 0xada   :  { %2738 = vrsqrt.f32 %v1225_v19  ;;  %v1224_v24 = vsub.f32 %v3295_v52, %v1216_v20 }
 0xadb   :  { %2740 = vrsqrt.f32 %v1226_v16 }
 0xadc   :  { %v1228_v29 = vadd.f32 1e-05, %v1224_v24 }
 0xadd   :  { %v1214_v21 = vpop.permute.xlu1 %1213 }
 0xade   :  { %v1223_v22 = vsub.f32 %v3299_v11, %v1214_v21 }
 0xae0   :  { %v1227_v25 = vadd.f32 1e-05, %v1223_v22 }
 0xae2   :  { %2742 = vrsqrt.f32 %v1227_v25 }
 0xae3   :  { %2744 = vrsqrt.f32 %v1228_v29 }
 0xae4   :  { %v2739_v26 = vpop.eup %2738 }
 0xae5   :  { %v2741_v30 = vpop.eup %2740  ;;  %v1239_v31 = vpop.permute.xlu0 %1238  ;;  %v1249_v32 = vmul.f32 %v2739_v26, %v1235_v9 }
 0xae6   :  { %v1250_v33 = vmul.f32 %v2741_v30, %v1239_v31 }
 0xae7   :  { %1257 = vrot.lane.b32.xlu1 %v1249_v32, %s2807_s29 }
 0xae8   :  { %1259 = vrot.lane.b32.xlu0 %v1250_v33, %s2807_s29 }
 0xaea   :  { %v1275_v41 = vpop.permute.xlu0 %1274 }
 0xaec   :  { %v2743_v7 = vpop.eup %2742 }
 0xaed   :  { %v2745_v36 = vpop.eup %2744 }
 0xaee   :  { %v1243_v8 = vpop.permute.xlu1 %1242  ;;  %v1287_v40 = vpop.permute.xlu0 %1286 }
 0xaef   :  { %v1251_v35 = vmul.f32 %v2743_v7, %v1243_v8 }
 0xaf1   :  { %1261 = vrot.lane.b32.xlu1 %v1251_v35, %s2807_s29 }
 0xaf2   :  { %v1247_v10 = vpop.permute.xlu1 %1246 }
 0xaf3   :  { %v1252_v37 = vmul.f32 %v2745_v36, %v1247_v10 }
 0xaf5   :  { %1338 = vperm.xlu1 %2667, %v1249_v32   ;;  %1263 = vrot.lane.b32.xlu0 %v1252_v37, %s2807_s29 }
 0xaf7   :  { %v1279_v39 = vpop.permute.xlu1 %1278 }
 0xaf9   :  { %2669 = vset.pattern.permute.xlu1 %v2805_v12  ;;  %1342 = vperm.xlu0 %2668, %v1250_v33  }
 0xafa   :  { %1294 = vperm.xlu1 %2669, %v1249_v32  }
 0xafb   :  { %v1283_v38 = vpop.permute.xlu1 %1282 }
 0xafd   :  { %2673 = vset.pattern.permute.xlu0 %v2805_v12 }
 0xafe   :  { %1298 = vperm.xlu1 %2669, %v1250_v33   ;;  %1302 = vperm.xlu0 %2673, %v1251_v35  }
 0xb02   :  { %2670 = vset.pattern.permute.xlu1 %v2806_v13  ;;  %2675 = vset.pattern.permute.xlu0 %v2808_v43 }
 0xb03   :  { %1350 = vperm.xlu1 %2670, %v1252_v37  }
 0xb07   :  { %2671 = vset.pattern.permute.xlu1 %v2805_v12 }
 0xb08   :  { %1306 = vperm.xlu1 %2671, %v1252_v37  }
 0xb0c   :  { %2672 = vset.pattern.permute.xlu1 %v2806_v13 }
 0xb0d   :  { %1346 = vperm.xlu1 %2672, %v1251_v35  }
 0xb11   :  { %2674 = vset.pattern.permute.xlu1 %v2809_v44 }
 0xb59   :  { %v1258_v55 = vpop.permute.xlu1 %1257 }
 0xb5a   :  { %v1260_v54 = vpop.permute.xlu0 %1259  ;;  %v1269_v17 = vmul.f32 %v1258_v55, %v3289_v2  ;;  %v2816_v2 = vmov 18  }
 0xb5b   :  { %v1270_v56 = vmul.f32 %v3285_v51, %v1260_v54 }
 0xb5c   :  { %v1289_v18 = vsub.f32 %v1275_v41, %v1269_v17 }
 0xb5d   :  { %v1290_v46 = vsub.f32 %v1279_v39, %v1270_v56 }
 0xb5f   :  { %1320 = vperm.xlu0 %2675, %v1290_v46   ;;  %1362 = vperm.xlu1 %2674, %v1290_v46  }
 0xb63   :  { %2676 = vset.pattern.permute.xlu0 %v2809_v44  ;;  %2677 = vset.pattern.permute.xlu1 %v2808_v43  ;;  %v1262_v48 = vpop.permute.xlu1 %1261 }
 0xb64   :  { %v1271_v34 = vmul.f32 %v1262_v48, %v3299_v11  ;;  %1315 = vperm.xlu1 %2677, %v1289_v18   ;;  %1358 = vperm.xlu0 %2676, %v1289_v18  }
 0xb66   :  { %v1291_v6 = vsub.f32 %v1283_v38, %v1271_v34 }
 0xb67   :  { %v1264_v5 = vpop.permute.xlu0 %1263 }
 0xb68   :  { %v1272_v59 = vmul.f32 %v3295_v52, %v1264_v5  ;;  %2678 = vset.pattern.permute.xlu1 %v2809_v44 }
 0xb69   :  { %1366 = vperm.xlu1 %2678, %v1291_v6  }
 0xb6a   :  { %v1292_v51 = vsub.f32 %v1287_v40, %v1272_v59 }
 0xb6c   :  { %1370 = vperm.xlu0 %2676, %v1292_v51  }
 0xb6d   :  { %2679 = vset.pattern.permute.xlu1 %v2808_v43 }
 0xb6e   :  { %1325 = vperm.xlu1 %2679, %v1291_v6  }
 0xb70   :  { %2680 = vset.pattern.permute.xlu0 %v2816_v2 }
 0xb71   :  { %1495 = vperm.xlu0 %2680, %v3248_v0  }
 0xb72   :  { %1330 = vperm.xlu1 %2679, %v1292_v51  }
 0xb74   :  { %v1339_v52 = vpop.permute.xlu1 %1338 }
 0xb75   :  { %1507 = vperm.xlu0 %2680, %v3321_v45   ;;  %v1353_v22 = vmul.f32 %v1339_v52, %v3201_v15  ;;  %v22_v52 = vld [vmem:[%s3708_s1 + $0x40] sm:$0xff] }
 0xb76   :  { %2681 = vset.pattern.permute.xlu1 %v2816_v2 }
 0xb77   :  { %1499 = vperm.xlu1 %2681, %v3304_v57  }
 0xb78   :  { %v1343_v47 = vpop.permute.xlu0 %1342 }
 0xb79   :  { %v1295_v11 = vpop.permute.xlu1 %1294  ;;  %v1354_v20 = vmul.f32 %v1343_v47, %v3215_v4  ;;  %v2769_v47 = vld [vmem:[%s3708_s1 + $0x80] sm:$0xff] }
 0xb7a   :  { %v1309_v24 = vmul.f32 %v1295_v11, %v3199_v42  ;;  %v23_v11 = vld [vmem:[%s3708_s1 + $0x48] sm:$0xff] }
 0xb7b   :  { %1503 = vperm.xlu1 %2681, %v3315_v63  }
 0xb7d   :  { %v1299_v61 = vpop.permute.xlu1 %1298  ;;  %v1303_v62 = vpop.permute.xlu0 %1302 }
 0xb7e   :  { %v1310_v21 = vmul.f32 %v1299_v61, %v3206_v23  ;;  %v1311_v56 = vmul.f32 %v1303_v62, %v3218_v53  ;;  %v24_v61 = vld [vmem:[%s3708_s1 + $0x50] sm:$0xff] }
 0xb82   :  { %v1351_v9 = vpop.permute.xlu1 %1350 }
 0xb83   :  { %v1356_v41 = vmul.f32 %v1351_v9, %v3238_v60  ;;  %v25_v9 = vld [vmem:[%s3708_s1 + $0x58] sm:$0xff] }
 0xb87   :  { %v1307_v58 = vpop.permute.xlu1 %1306 }
 0xb88   :  { %v1312_v18 = vmul.f32 %v1307_v58, %v3232_v1 }
 0xb8c   :  { %v1347_v49 = vpop.permute.xlu1 %1346 }
 0xb8d   :  { %v1355_v36 = vmul.f32 %v1347_v49, %v3224_v14 }
 0xbde   :  { %v1321_v16 = vpop.permute.xlu0 %1320  ;;  %v1363_v19 = vpop.permute.xlu1 %1362 }
 0xbdf   :  { %v1334_v25 = vadd.f32 %v1321_v16, %v1310_v21  ;;  %v1374_v26 = vadd.f32 %v1363_v19, %v1354_v20 }
 0xbe1   :  { %v1379_v33 = vmax.f32 %v1334_v25, 0.0  ;;  %v1380_v7 = vmax.f32 %v1374_v26, 0.0 }
 0xbe3   :  { %v1359_v29 = vpop.permute.xlu0 %1358  ;;  %v1316_v30 = vpop.permute.xlu1 %1315 }
 0xbe4   :  { %v1373_v31 = vadd.f32 %v1359_v29, %v1353_v22  ;;  %v1333_v32 = vadd.f32 %v1316_v30, %v1309_v24 }
 0xbe6   :  { %v1378_v8 = vmax.f32 %v1373_v31, 0.0  ;;  %v1377_v35 = vmax.f32 %v1333_v32, 0.0 }
 0xbe8   :  { %v2568_v10 = vpack.c.bf16 %v1380_v7, %v1378_v8  ;;  %v2570_v37 = vpack.c.bf16 %v1379_v33, %v1377_v35  ;;  %v1367_v39 = vpop.permute.xlu1 %1366 }
 0xbe9   :  { %v1375_v38 = vadd.f32 %v1367_v39, %v1355_v36 }
 0xbea   :  { %2569 = vmatprep.subr.bf16.mxu1 %v2568_v10 }
 0xbeb   :  { %v1371_v40 = vpop.permute.xlu0 %1370  ;;  %2571 = vmatpush1.bf16.msra.mxu1 %v2570_v37  ;;  %v1382_v46 = vmax.f32 %v1375_v38, 0.0 }
 0xbec   :  { %v1376_v54 = vadd.f32 %v1371_v40, %v1356_v41 }
 0xbed   :  { %v1326_v55 = vpop.permute.xlu1 %1325 }
 0xbee   :  { %v1384_v17 = vmax.f32 %v1376_v54, 0.0  ;;  %v1335_v34 = vadd.f32 %v1326_v55, %v1311_v56 }
 0xbf0   :  { %v2572_v48 = vpack.c.bf16 %v1384_v17, %v1382_v46  ;;  %v1381_v59 = vmax.f32 %v1335_v34, 0.0  ;;  %v1496_v16 = vpop.permute.xlu0 %1495 }
 0xbf1   :  { %v1331_v6 = vpop.permute.xlu1 %1330 }
 0xbf2   :  { %v1336_v5 = vadd.f32 %v1331_v6, %v1312_v18  ;;  %2573 = vmatprep.subr.bf16.mxu1 %v2572_v48 }
 0xbf4   :  { %v1383_v51 = vmax.f32 %v1336_v5, 0.0  ;;  %v1508_v41 = vpop.permute.xlu0 %1507 }
 0xbf6   :  { %v2574_v2 = vpack.c.bf16 %v1383_v51, %v1381_v59  ;;  %v1500_v26 = vpop.permute.xlu1 %1499 }
 0xbf8   :  { %2575 = vmatpush1.bf16.msra.mxu1 %v2574_v2 }
 0xbfa   :  { %v1504_v35 = vpop.permute.xlu1 %1503 }
 0xbfb   :  { %2402 = vmatmul.mubr.msk.f32.vlgmr.msra.gmra.mrb[16].mxu1 %vm195_vm1, %v22_v52 }
 0xbfc   :  { %1467 = vmatprep.mubr.f32.mxu1 %v2801_v3 }
 0xbff   :  { %2403 = vmatmul.mubr.msk.f32.gmra.mrb[18].mxu1 %vm195_vm1, %v23_v11 }
 0xc00   :  { %1473 = vmatprep.mubr.f32.mxu1 %v2801_v3 }
 0xc03   :  { %2404 = vmatmul.mubr.msk.f32.gmra.mrb[20].mxu1 %vm195_vm1, %v24_v61 }
 0xc04   :  { %1479 = vmatprep.mubr.f32.mxu1 %v2801_v3 }
 0xc07   :  { %2405 = vmatmul.mubr.msk.f32.gmra.mrb[22].mxu1 %vm195_vm1, %v25_v9 }
 0xc08   :  { %2522 = vmatprep.mubr.msk.f32.mxu1 %vm195_vm1, %v2769_v47 }
 0xcce   :  { %v1463_v58 = vpop.f32.mrb[16].mxu1 }
 0xccf   :  { %v1486_v62 = vadd.f32 %v1463_v58, %v3199_v42  ;;  %v1465_v49 = vpop.f32.mrb[17].mxu1 }
 0xcd0   :  { %v1487_v19 = vadd.f32 %v1465_v49, %v3201_v15 }
 0xcd1   :  { %v3389_v20 = vadd.f32 %v1496_v16, %v1486_v62 }
 0xcd2   :  { %v3391_v21 = vadd.f32 %v1496_v16, %v1487_v19  ;;  %v1469_v22 = vpop.f32.mrb[18].mxu1 }
 0xcd3   :  { %v1488_v24 = vadd.f32 %v1469_v22, %v3206_v23  ;;  %1518 = vadd.xlane.f32.xlu1 %v3389_v20  ;;  %v1471_v25 = vpop.f32.mrb[19].mxu1  ;;  %v1526_v42 = vmul.f32 %v3389_v20, %v3389_v20 }
 0xcd4   :  { %1538 = vadd.xlane.f32.xlu0 %v3391_v21  ;;  %v1489_v15 = vadd.f32 %v1471_v25, %v3215_v4  ;;  %v1546_v32 = vmul.f32 %v3391_v21, %v3391_v21 }
 0xcd5   :  { %v3396_v29 = vadd.f32 %v1500_v26, %v1488_v24 }
 0xcd6   :  { %v1475_v30 = vpop.f32.mrb[20].mxu1  ;;  %v3405_v33 = vadd.f32 %v1500_v26, %v1489_v15 }
 0xcd7   :  { %1530 = vadd.xlane.f32.xlu1 %v1526_v42  ;;  %v1477_v31 = vpop.f32.mrb[21].mxu1  ;;  %v1490_v23 = vadd.f32 %v1475_v30, %v3218_v53  ;;  %v1527_v10 = vmul.f32 %v3396_v29, %v3396_v29 }
 0xcd8   :  { %1520 = vadd.xlane.f32.xlu0 %v3396_v29  ;;  %v1491_v4 = vadd.f32 %v1477_v31, %v3224_v14  ;;  %v1547_v39 = vmul.f32 %v3405_v33, %v3405_v33 }
 0xcd9   :  { %v3408_v36 = vadd.f32 %v1504_v35, %v1490_v23 }
 0xcda   :  { %v1481_v7 = vpop.f32.mrb[22].mxu1  ;;  %v3414_v53 = vadd.f32 %v1504_v35, %v1491_v4 }
 0xcdb   :  { %1550 = vadd.xlane.f32.xlu1 %v1546_v32  ;;  %v1483_v8 = vpop.f32.mrb[23].mxu1  ;;  %v1492_v37 = vadd.f32 %v1481_v7, %v3232_v1  ;;  %v1528_v14 = vmul.f32 %v3408_v36, %v3408_v36 }
 0xcdc   :  { %1540 = vadd.xlane.f32.xlu0 %v3405_v33  ;;  %v1493_v40 = vadd.f32 %v1483_v8, %v3238_v60  ;;  %v1548_v1 = vmul.f32 %v3414_v53, %v3414_v53  ;;  %v2817_v60 = vmov 11  }
 0xcdd   :  { %v3422_v38 = vadd.f32 %v1508_v41, %v1492_v37  ;;  %2682 = vset.pattern.permute.xlu1 %v2817_v60  ;;  %2683 = vset.pattern.permute.xlu0 %v2817_v60  ;;  %v2818_v37 = vmov 15  }
 0xcde   :  { %v3428_v54 = vadd.f32 %v1508_v41, %v1493_v40 }
 0xcdf   :  { %1522 = vadd.xlane.f32.xlu1 %v3408_v36  ;;  %v1529_v55 = vmul.f32 %v3422_v38, %v3422_v38 }
 0xce0   :  { %1532 = vadd.xlane.f32.xlu0 %v1527_v10  ;;  %v1549_v56 = vmul.f32 %v3428_v54, %v3428_v54 }
 0xce3   :  { %1542 = vadd.xlane.f32.xlu1 %v3414_v53 }
 0xce4   :  { %1552 = vadd.xlane.f32.xlu0 %v1547_v39 }
 0xce7   :  { %1534 = vadd.xlane.f32.xlu1 %v1528_v14 }
 0xce8   :  { %1524 = vadd.xlane.f32.xlu0 %v3422_v38 }
 0xceb   :  { %1554 = vadd.xlane.f32.xlu1 %v1548_v1 }
 0xcec   :  { %1544 = vadd.xlane.f32.xlu0 %v3428_v54 }
 0xcf0   :  { %1536 = vadd.xlane.f32.xlu0 %v1529_v55 }
 0xcf4   :  { %1556 = vadd.xlane.f32.xlu0 %v1549_v56 }
 0xcfc   :  { %1688 = vperm.xlu1 %2682, %v3248_v0  }
 0xd60   :  { %v1519_v46 = vpop.xlane.xlu1 %1518 }
 0xd61   :  { %v1539_v17 = vpop.xlane.xlu0 %1538 }
 0xd62   :  { %v1558_v51 = vsel %vm180_vm2, %v1519_v46, %v1539_v17 }
 0xd64   :  { %v1531_v18 = vpop.xlane.xlu1 %1530 }
 0xd65   :  { %v1521_v48 = vpop.xlane.xlu0 %1520  ;;  %v1562_v52 = vsel %vm185_vm3, %v1558_v51, %v1531_v18 }
 0xd68   :  { %v1551_v34 = vpop.xlane.xlu1 %1550 }
 0xd69   :  { %v1541_v6 = vpop.xlane.xlu0 %1540  ;;  %v1566_v9 = vsel %vm190_vm4, %v1562_v52, %v1551_v34 }
 0xd6a   :  { %v1559_v2 = vsel %vm180_vm2, %v1521_v48, %v1541_v6 }
 0xd6c   :  { %v1523_v5 = vpop.xlane.xlu1 %1522 }
 0xd6d   :  { %v1533_v59 = vpop.xlane.xlu0 %1532 }
 0xd6e   :  { %v1563_v11 = vsel %vm185_vm3, %v1559_v2, %v1533_v59 }
 0xd70   :  { %v1543_v58 = vpop.xlane.xlu1 %1542 }
 0xd71   :  { %v1553_v61 = vpop.xlane.xlu0 %1552  ;;  %v1560_v25 = vsel %vm180_vm2, %v1523_v5, %v1543_v58 }
 0xd72   :  { %v1567_v47 = vsel %vm190_vm4, %v1563_v11, %v1553_v61 }
 0xd73   :  { %v2576_v62 = vpack.c.bf16 %v1567_v47, %v1566_v9 }
 0xd74   :  { %v1535_v16 = vpop.xlane.xlu1 %1534 }
 0xd75   :  { %v1525_v49 = vpop.xlane.xlu0 %1524  ;;  %2577 = vmatprep.subr.bf16.mxu0 %v2576_v62  ;;  %v1564_v42 = vsel %vm185_vm3, %v1560_v25, %v1535_v16 }
 0xd76   :  { %2579 = vmatpush3.bf16.msra.mxu0 %v2576_v62 }
 0xd78   :  { %v1555_v24 = vpop.xlane.xlu1 %1554 }
 0xd79   :  { %v1545_v19 = vpop.xlane.xlu0 %1544  ;;  %v1568_v31 = vsel %vm190_vm4, %v1564_v42, %v1555_v24 }
 0xd7a   :  { %v1561_v26 = vsel %vm180_vm2, %v1525_v49, %v1545_v19 }
 0xd7c   :  { %v1689_v39 = vpop.permute.xlu1 %1688 }
 0xd7d   :  { %v1537_v22 = vpop.xlane.xlu0 %1536 }
 0xd7e   :  { %v1565_v15 = vsel %vm185_vm3, %v1561_v26, %v1537_v22 }
 0xd81   :  { %v1557_v30 = vpop.xlane.xlu0 %1556 }
 0xd82   :  { %v1569_v23 = vsel %vm190_vm4, %v1565_v15, %v1557_v30 }
 0xd83   :  { %v2580_v32 = vpack.c.bf16 %v1569_v23, %v1568_v31 }
 0xd85   :  { %2581 = vmatprep.subr.bf16.mxu0 %v2580_v32 }
 0xd86   :  { %2583 = vmatpush3.bf16.msra.mxu0 %v2580_v32 }
 0xd89   :  { %2509 = vmatmul.mubr.msk.f32.vlgmr.msra.gmra.mrb[20].mxu0 %vm195_vm1, %v3266_v27 }
 0xd8a   :  { %2511 = vmatprep.mubr.msk.f32.mxu0 %vm195_vm1, %v3273_v28 }
 0xd8d   :  { %2512 = vmatmul.mubr.msk.f32.gmra.mrb[22].mxu0 %vm195_vm1, %v3280_v50 }
 0xd8e   :  { %1915 = vmatprep.mubr.f32.mxu0 %v2801_v3 }
 0xe5c   :  { %v3455_v7 = vpop.f32.mrb[20].mxu0 }
 0xe5d   :  { %v1656_v8 = vmul.f32 %v3455_v7, %v3455_v7  ;;  %v3459_v35 = vpop.f32.mrb[21].mxu0 }
 0xe5e   :  { %v1655_v4 = vmul.f32 %v3459_v35, %v3459_v35 }
 0xe5f   :  { %1665 = vrot.lane.b32.xlu0 %v1656_v8, %s2803_s28 }
 0xe60   :  { %1663 = vrot.lane.b32.xlu1 %v1655_v4, %s2803_s28  ;;  %v3465_v27 = vpop.f32.mrb[22].mxu0 }
 0xe61   :  { %v1658_v28 = vmul.f32 %v3465_v27, %v3465_v27  ;;  %v3469_v50 = vpop.f32.mrb[23].mxu0 }
 0xe62   :  { %v1657_v10 = vmul.f32 %v3469_v50, %v3469_v50 }
 0xe63   :  { %1692 = vperm.xlu0 %2683, %v3304_v57  }
 0xe64   :  { %1669 = vrot.lane.b32.xlu1 %v1658_v28, %s2803_s28 }
 0xe67   :  { %2684 = vset.pattern.permute.xlu0 %v2818_v37 }
 0xe68   :  { %1667 = vrot.lane.b32.xlu1 %v1657_v10, %s2803_s28  ;;  %1728 = vperm.xlu0 %2684, %v3248_v0  }
 0xe6c   :  { %1696 = vperm.xlu1 %2682, %v3315_v63   ;;  %1740 = vperm.xlu0 %2684, %v3321_v45  }
 0xe70   :  { %1700 = vperm.xlu1 %2682, %v3321_v45   ;;  %2687 = vset.pattern.permute.xlu0 %v2806_v13 }
 0xe74   :  { %2685 = vset.pattern.permute.xlu1 %v2818_v37 }
 0xe75   :  { %1732 = vperm.xlu1 %2685, %v3304_v57  }
 0xe79   :  { %1736 = vperm.xlu1 %2685, %v3315_v63  }
 0xe7d   :  { %2686 = vset.pattern.permute.xlu1 %v2806_v13 }
 0xed1   :  { %v1666_v41 = vpop.permute.xlu0 %1665 }
 0xed2   :  { %v1676_v14 = vsub.f32 %v3455_v7, %v1666_v41  ;;  %v1664_v40 = vpop.permute.xlu1 %1663 }
 0xed3   :  { %v1675_v1 = vsub.f32 %v3459_v35, %v1664_v40 }
 0xed4   :  { %v1680_v55 = vadd.f32 1e-05, %v1676_v14 }
 0xed5   :  { %v1679_v56 = vadd.f32 1e-05, %v1675_v1 }
 0xed6   :  { %v1670_v60 = vpop.permute.xlu1 %1669 }
 0xed7   :  { %2746 = vrsqrt.f32 %v1679_v56  ;;  %v1678_v18 = vsub.f32 %v3465_v27, %v1670_v60 }
 0xed8   :  { %2748 = vrsqrt.f32 %v1680_v55 }
 0xed9   :  { %v1682_v6 = vadd.f32 1e-05, %v1678_v18 }
 0xeda   :  { %v1668_v46 = vpop.permute.xlu1 %1667 }
 0xedb   :  { %v1677_v17 = vsub.f32 %v3469_v50, %v1668_v46 }
 0xedd   :  { %v1681_v48 = vadd.f32 1e-05, %v1677_v17 }
 0xedf   :  { %2750 = vrsqrt.f32 %v1681_v48 }
 0xee0   :  { %2752 = vrsqrt.f32 %v1682_v6 }
 0xee1   :  { %v2747_v34 = vpop.eup %2746 }
 0xee2   :  { %v2749_v5 = vpop.eup %2748  ;;  %v1693_v59 = vpop.permute.xlu0 %1692  ;;  %v1703_v51 = vmul.f32 %v2747_v34, %v1689_v39 }
 0xee3   :  { %v1704_v2 = vmul.f32 %v2749_v5, %v1693_v59 }
 0xee4   :  { %1711 = vrot.lane.b32.xlu1 %v1703_v51, %s2807_s29 }
 0xee5   :  { %1713 = vrot.lane.b32.xlu0 %v1704_v2, %s2807_s29 }
 0xee7   :  { %v1729_v49 = vpop.permute.xlu0 %1728 }
 0xee9   :  { %v2751_v52 = vpop.eup %2750 }
 0xeea   :  { %v2753_v9 = vpop.eup %2752 }
 0xeeb   :  { %v1697_v11 = vpop.permute.xlu1 %1696  ;;  %v1741_v19 = vpop.permute.xlu0 %1740 }
 0xeec   :  { %v1705_v61 = vmul.f32 %v2751_v52, %v1697_v11 }
 0xeee   :  { %1715 = vrot.lane.b32.xlu1 %v1705_v61, %s2807_s29 }
 0xeef   :  { %v1701_v47 = vpop.permute.xlu1 %1700 }
 0xef0   :  { %v1706_v58 = vmul.f32 %v2753_v9, %v1701_v47 }
 0xef2   :  { %1792 = vperm.xlu1 %2686, %v1703_v51   ;;  %1717 = vrot.lane.b32.xlu0 %v1706_v58, %s2807_s29 }
 0xef4   :  { %v1733_v62 = vpop.permute.xlu1 %1732 }
 0xef6   :  { %2688 = vset.pattern.permute.xlu1 %v2805_v12  ;;  %1796 = vperm.xlu0 %2687, %v1704_v2  }
 0xef7   :  { %1748 = vperm.xlu1 %2688, %v1703_v51  }
 0xef8   :  { %v1737_v16 = vpop.permute.xlu1 %1736 }
 0xefa   :  { %2692 = vset.pattern.permute.xlu0 %v2805_v12 }
 0xefb   :  { %1752 = vperm.xlu1 %2688, %v1704_v2   ;;  %1756 = vperm.xlu0 %2692, %v1705_v61  }
 0xeff   :  { %2689 = vset.pattern.permute.xlu1 %v2806_v13  ;;  %2694 = vset.pattern.permute.xlu0 %v2808_v43 }
 0xf00   :  { %1804 = vperm.xlu1 %2689, %v1706_v58  }
 0xf04   :  { %2690 = vset.pattern.permute.xlu1 %v2805_v12 }
 0xf05   :  { %1760 = vperm.xlu1 %2690, %v1706_v58  }
 0xf09   :  { %2691 = vset.pattern.permute.xlu1 %v2806_v13 }
 0xf0a   :  { %1800 = vperm.xlu1 %2691, %v1705_v61  }
 0xf0e   :  { %2693 = vset.pattern.permute.xlu1 %v2809_v44 }
 0xf56   :  { %v1712_v24 = vpop.permute.xlu1 %1711 }
 0xf57   :  { %v1714_v22 = vpop.permute.xlu0 %1713  ;;  %v1723_v42 = vmul.f32 %v1712_v24, %v3459_v35  ;;  %v2819_v35 = vmov 19  }
 0xf58   :  { %v1724_v25 = vmul.f32 %v3455_v7, %v1714_v22 }
 0xf59   :  { %v1743_v15 = vsub.f32 %v1729_v49, %v1723_v42 }
 0xf5a   :  { %v1744_v26 = vsub.f32 %v1733_v62, %v1724_v25 }
 0xf5c   :  { %1774 = vperm.xlu0 %2694, %v1744_v26   ;;  %1816 = vperm.xlu1 %2693, %v1744_v26  }
 0xf60   :  { %2695 = vset.pattern.permute.xlu0 %v2809_v44  ;;  %2696 = vset.pattern.permute.xlu1 %v2808_v43  ;;  %v1716_v30 = vpop.permute.xlu1 %1715 }
 0xf61   :  { %v1725_v31 = vmul.f32 %v1716_v30, %v3469_v50  ;;  %1769 = vperm.xlu1 %2696, %v1743_v15   ;;  %1812 = vperm.xlu0 %2695, %v1743_v15   ;;  %v26_v30 = vld [vmem:[%s3708_s1 + $0x60] sm:$0xff] }
 0xf63   :  { %v1745_v23 = vsub.f32 %v1737_v16, %v1725_v31  ;;  %v27_v31 = vld [vmem:[%s3708_s1 + $0x68] sm:$0xff] }
 0xf64   :  { %v1718_v32 = vpop.permute.xlu0 %1717 }
 0xf65   :  { %v1726_v8 = vmul.f32 %v3465_v27, %v1718_v32  ;;  %2697 = vset.pattern.permute.xlu1 %v2809_v44  ;;  %v29_v32 = vld [vmem:[%s3708_s1 + $0x78] sm:$0xff] }
 0xf66   :  { %1820 = vperm.xlu1 %2697, %v1745_v23  }
 0xf67   :  { %v1746_v7 = vsub.f32 %v1741_v19, %v1726_v8 }
 0xf69   :  { %1824 = vperm.xlu0 %2695, %v1746_v7  }
 0xf6a   :  { %2698 = vset.pattern.permute.xlu1 %v2808_v43 }
 0xf6b   :  { %1779 = vperm.xlu1 %2698, %v1745_v23   ;;  %v28_v23 = vld [vmem:[%s3708_s1 + $0x70] sm:$0xff] }
 0xf6d   :  { %2699 = vset.pattern.permute.xlu0 %v2819_v35 }
 0xf6e   :  { %1949 = vperm.xlu0 %2699, %v3248_v0  }
 0xf6f   :  { %1784 = vperm.xlu1 %2698, %v1746_v7  }
 0xf71   :  { %v1793_v4 = vpop.permute.xlu1 %1792 }
 0xf72   :  { %1961 = vperm.xlu0 %2699, %v3321_v45  }
 0xf73   :  { %2700 = vset.pattern.permute.xlu1 %v2819_v35 }
 0xf74   :  { %1953 = vperm.xlu1 %2700, %v3304_v57   ;;  %v1807_v57 = vmul.f32 %v1793_v4, %v3391_v21 }
 0xf75   :  { %v1797_v10 = vpop.permute.xlu0 %1796 }
 0xf76   :  { %v1749_v27 = vpop.permute.xlu1 %1748  ;;  %v1808_v1 = vmul.f32 %v1797_v10, %v3405_v33 }
 0xf77   :  { %v1763_v45 = vmul.f32 %v1749_v27, %v3389_v20 }
 0xf78   :  { %1957 = vperm.xlu1 %2700, %v3315_v63  }
 0xf7a   :  { %v1753_v28 = vpop.permute.xlu1 %1752  ;;  %v1757_v39 = vpop.permute.xlu0 %1756 }
 0xf7b   :  { %v1764_v0 = vmul.f32 %v1753_v28, %v3396_v29  ;;  %v1765_v58 = vmul.f32 %v1757_v39, %v3408_v36 }
 0xf7f   :  { %v1805_v50 = vpop.permute.xlu1 %1804 }
 0xf80   :  { %v1810_v52 = vmul.f32 %v1805_v50, %v3428_v54 }
 0xf84   :  { %v1761_v37 = vpop.permute.xlu1 %1760 }
 0xf85   :  { %v1766_v16 = vmul.f32 %v1761_v37, %v3422_v38 }
 0xf89   :  { %v1801_v41 = vpop.permute.xlu1 %1800 }
 0xf8a   :  { %v1809_v5 = vmul.f32 %v1801_v41, %v3414_v53 }
 0xfdb   :  { %v1775_v14 = vpop.permute.xlu0 %1774  ;;  %v1817_v40 = vpop.permute.xlu1 %1816 }
 0xfdc   :  { %v1788_v55 = vadd.f32 %v1775_v14, %v1764_v0  ;;  %v1828_v63 = vadd.f32 %v1817_v40, %v1808_v1 }
 0xfde   :  { %v1833_v18 = vmax.f32 %v1788_v55, 0.0  ;;  %v1834_v48 = vmax.f32 %v1828_v63, 0.0 }
 0xfe0   :  { %v1813_v56 = vpop.permute.xlu0 %1812  ;;  %v1770_v60 = vpop.permute.xlu1 %1769 }
 0xfe1   :  { %v1827_v46 = vadd.f32 %v1813_v56, %v1807_v57  ;;  %v1787_v17 = vadd.f32 %v1770_v60, %v1763_v45 }
 0xfe3   :  { %v1832_v34 = vmax.f32 %v1827_v46, 0.0  ;;  %v1831_v6 = vmax.f32 %v1787_v17, 0.0 }
 0xfe5   :  { %v2584_v59 = vpack.c.bf16 %v1834_v48, %v1832_v34  ;;  %v2586_v51 = vpack.c.bf16 %v1833_v18, %v1831_v6  ;;  %v1821_v2 = vpop.permute.xlu1 %1820 }
 0xfe6   :  { %v1829_v11 = vadd.f32 %v1821_v2, %v1809_v5 }
 0xfe7   :  { %2585 = vmatprep.subr.bf16.mxu0 %v2584_v59 }
 0xfe8   :  { %v1825_v61 = vpop.permute.xlu0 %1824  ;;  %2587 = vmatpush1.bf16.msra.mxu0 %v2586_v51  ;;  %v1836_v62 = vmax.f32 %v1829_v11, 0.0 }
 0xfe9   :  { %v1830_v9 = vadd.f32 %v1825_v61, %v1810_v52 }
 0xfea   :  { %v1780_v47 = vpop.permute.xlu1 %1779 }
 0xfeb   :  { %v1838_v49 = vmax.f32 %v1830_v9, 0.0  ;;  %v1789_v22 = vadd.f32 %v1780_v47, %v1765_v58 }
 0xfed   :  { %v2588_v19 = vpack.c.bf16 %v1838_v49, %v1836_v62  ;;  %v1835_v26 = vmax.f32 %v1789_v22, 0.0  ;;  %v1950_v4 = vpop.permute.xlu0 %1949 }
 0xfee   :  { %v1785_v24 = vpop.permute.xlu1 %1784 }
 0xfef   :  { %v1790_v25 = vadd.f32 %v1785_v24, %v1766_v16  ;;  %2589 = vmatprep.subr.bf16.mxu0 %v2588_v19 }
 0xff1   :  { %v1837_v42 = vmax.f32 %v1790_v25, 0.0  ;;  %v1962_v17 = vpop.permute.xlu0 %1961 }
 0xff3   :  { %v2590_v15 = vpack.c.bf16 %v1837_v42, %v1835_v26  ;;  %v1954_v39 = vpop.permute.xlu1 %1953 }
 0xff5   :  { %2591 = vmatpush1.bf16.msra.mxu0 %v2590_v15 }
 0xff7   :  { %v1958_v55 = vpop.permute.xlu1 %1957 }
 0xff8   :  { %2410 = vmatmul.mubr.msk.f32.vlgmr.msra.gmra.mrb[24].mxu0 %vm195_vm1, %v26_v30 }
 0xff9   :  { %1921 = vmatprep.mubr.f32.mxu0 %v2801_v3 }
 0xffc   :  { %2411 = vmatmul.mubr.msk.f32.gmra.mrb[26].mxu0 %vm195_vm1, %v27_v31 }
 0xffd   :  { %1927 = vmatprep.mubr.f32.mxu0 %v2801_v3 }
0x1000   :  { %2412 = vmatmul.mubr.msk.f32.gmra.mrb[28].mxu0 %vm195_vm1, %v28_v23 }
0x1001   :  { %1933 = vmatprep.mubr.f32.mxu0 %v2801_v3 }
0x1004   :  { %2413 = vmatmul.mubr.msk.f32.gmra.mrb[30].mxu0 %vm195_vm1, %v29_v32 }
0x10cb   :  { %v1917_v8 = vpop.f32.mrb[24].mxu0 }
0x10cc   :  { %v1940_v7 = vadd.f32 %v1917_v8, %v3389_v20  ;;  %v1919_v35 = vpop.f32.mrb[25].mxu0 }
0x10cd   :  { %v1941_v27 = vadd.f32 %v1919_v35, %v3391_v21 }
0x10ce   :  { %v3540_v28 = vadd.f32 %v1950_v4, %v1940_v7 }
0x10cf   :  { %v3542_v50 = vadd.f32 %v1950_v4, %v1941_v27  ;;  %v1923_v10 = vpop.f32.mrb[26].mxu0 }
0x10d0   :  { %v1942_v3 = vadd.f32 %v1923_v10, %v3396_v29  ;;  %1972 = vadd.xlane.f32.xlu1 %v3540_v28  ;;  %v1925_v37 = vpop.f32.mrb[27].mxu0  ;;  %v1980_v20 = vmul.f32 %v3540_v28, %v3540_v28 }
0x10d1   :  { %1992 = vadd.xlane.f32.xlu0 %v3542_v50  ;;  %v1943_v21 = vadd.f32 %v1925_v37, %v3405_v33  ;;  %v2000_v1 = vmul.f32 %v3542_v50, %v3542_v50  ;;  %v2771_v37 = vld [vmem:[%s3708_s1 + $0x90] sm:$0xff] }
0x10d2   :  { %v3547_v41 = vadd.f32 %v1954_v39, %v1942_v3  ;;  %v2770_v3 = vld [vmem:[%s3708_s1 + $0x88] sm:$0xff] }
0x10d3   :  { %v1929_v14 = vpop.f32.mrb[28].mxu0  ;;  %v3556_v0 = vadd.f32 %v1954_v39, %v1943_v21  ;;  %v2772_v39 = vld [vmem:[%s3708_s1 + $0x98] sm:$0xff] }
0x10d4   :  { %1984 = vadd.xlane.f32.xlu1 %v1980_v20  ;;  %v1931_v40 = vpop.f32.mrb[29].mxu0  ;;  %v1944_v29 = vadd.f32 %v1929_v14, %v3408_v36  ;;  %v1981_v56 = vmul.f32 %v3547_v41, %v3547_v41  ;;  %v2820_v20 = vmov 20  }
0x10d5   :  { %1974 = vadd.xlane.f32.xlu0 %v3547_v41  ;;  %v1945_v33 = vadd.f32 %v1931_v40, %v3414_v53  ;;  %v2001_v46 = vmul.f32 %v3556_v0, %v3556_v0  ;;  %2701 = vset.pattern.permute.xlu1 %v2820_v20 }
0x10d6   :  { %v3559_v63 = vadd.f32 %v1958_v55, %v1944_v29  ;;  %2702 = vset.pattern.permute.xlu0 %v2820_v20 }
0x10d7   :  { %v1935_v57 = vpop.f32.mrb[30].mxu0  ;;  %v3565_v36 = vadd.f32 %v1958_v55, %v1945_v33  ;;  %v3629_v55 = vld [vmem:[%s3708_s1 + $0xa8] sm:$0xff] }
0x10d8   :  { %2004 = vadd.xlane.f32.xlu1 %v2000_v1  ;;  %v1937_v45 = vpop.f32.mrb[31].mxu0  ;;  %v1946_v60 = vadd.f32 %v1935_v57, %v3422_v38  ;;  %v1982_v53 = vmul.f32 %v3559_v63, %v3559_v63 }
0x10d9   :  { %1994 = vadd.xlane.f32.xlu0 %v3556_v0  ;;  %v1947_v48 = vadd.f32 %v1937_v45, %v3428_v54  ;;  %v2002_v38 = vmul.f32 %v3565_v36, %v3565_v36 }
0x10da   :  { %v3573_v18 = vadd.f32 %v1962_v17, %v1946_v60  ;;  %v3639_v60 = vld [vmem:[%s3708_s1 + $0xa0] sm:$0xff] }
0x10db   :  { %v3579_v34 = vadd.f32 %v1962_v17, %v1947_v48  ;;  %v3652_v17 = vld [vmem:[%s3708_s1 + $0xb0] sm:$0xff] }
0x10dc   :  { %1976 = vadd.xlane.f32.xlu1 %v3559_v63  ;;  %v1983_v6 = vmul.f32 %v3573_v18, %v3573_v18 }
0x10dd   :  { %1986 = vadd.xlane.f32.xlu0 %v1981_v56  ;;  %v2003_v5 = vmul.f32 %v3579_v34, %v3579_v34  ;;  %v2821_v56 = vmov 21  }
0x10e0   :  { %1996 = vadd.xlane.f32.xlu1 %v3565_v36 }
0x10e1   :  { %2006 = vadd.xlane.f32.xlu0 %v2001_v46  ;;  %v3646_v46 = vld [vmem:[%s3708_s1 + $0xb8] sm:$0xff]  ;;  %s2825_s1 = smov [#allocation2]  }
0x10e4   :  { %1988 = vadd.xlane.f32.xlu1 %v1982_v53 }
0x10e5   :  { %1978 = vadd.xlane.f32.xlu0 %v3573_v18 }
0x10e8   :  { %2008 = vadd.xlane.f32.xlu1 %v2002_v38 }
0x10e9   :  { %1998 = vadd.xlane.f32.xlu0 %v3579_v34 }
0x10ed   :  { %1990 = vadd.xlane.f32.xlu0 %v1983_v6 }
0x10f1   :  { %2010 = vadd.xlane.f32.xlu0 %v2003_v5 }
0x115d   :  { %v1973_v54 = vpop.xlane.xlu1 %1972 }
0x115e   :  { %v1993_v59 = vpop.xlane.xlu0 %1992 }
0x115f   :  { %v2012_v47 = vsel %vm180_vm2, %v1973_v54, %v1993_v59 }
0x1161   :  { %v1985_v51 = vpop.xlane.xlu1 %1984 }
0x1162   :  { %v1975_v2 = vpop.xlane.xlu0 %1974  ;;  %v2016_v62 = vsel %vm185_vm3, %v2012_v47, %v1985_v51 }
0x1165   :  { %v2005_v52 = vpop.xlane.xlu1 %2004 }
0x1166   :  { %v1995_v11 = vpop.xlane.xlu0 %1994  ;;  %v2020_v19 = vsel %vm190_vm4, %v2016_v62, %v2005_v52 }
0x1167   :  { %v2013_v58 = vsel %vm180_vm2, %v1975_v2, %v1995_v11 }
0x1169   :  { %v1977_v61 = vpop.xlane.xlu1 %1976 }
0x116a   :  { %v1987_v9 = vpop.xlane.xlu0 %1986 }
0x116b   :  { %v2017_v49 = vsel %vm185_vm3, %v2013_v58, %v1987_v9 }
0x116d   :  { %v1997_v24 = vpop.xlane.xlu1 %1996 }
0x116e   :  { %v2007_v16 = vpop.xlane.xlu0 %2006  ;;  %v2014_v23 = vsel %vm180_vm2, %v1977_v61, %v1997_v24 }
0x116f   :  { %v2021_v22 = vsel %vm190_vm4, %v2017_v49, %v2007_v16 }
0x1170   :  { %v2592_v25 = vpack.c.bf16 %v2021_v22, %v2020_v19 }
0x1171   :  { %v1989_v42 = vpop.xlane.xlu1 %1988 }
0x1172   :  { %v1979_v26 = vpop.xlane.xlu0 %1978  ;;  %2593 = vmatprep.subr.bf16.mxu1 %v2592_v25  ;;  %v2018_v8 = vsel %vm185_vm3, %v2014_v23, %v1989_v42 }
0x1173   :  { %2595 = vmatpush3.bf16.msra.mxu1 %v2592_v25 }
0x1175   :  { %v2009_v31 = vpop.xlane.xlu1 %2008 }
0x1176   :  { %v1999_v15 = vpop.xlane.xlu0 %1998  ;;  %v2022_v4 = vsel %vm190_vm4, %v2018_v8, %v2009_v31 }
0x1177   :  { %v2015_v32 = vsel %vm180_vm2, %v1979_v26, %v1999_v15  ;;  %v2822_v15 = vmov 22  }
0x117a   :  { %v1991_v30 = vpop.xlane.xlu0 %1990 }
0x117b   :  { %v2019_v7 = vsel %vm185_vm3, %v2015_v32, %v1991_v30 }
0x117e   :  { %v2011_v35 = vpop.xlane.xlu0 %2010 }
0x117f   :  { %v2023_v27 = vsel %vm190_vm4, %v2019_v7, %v2011_v35 }
0x1180   :  { %v2596_v10 = vpack.c.bf16 %v2023_v27, %v2022_v4 }
0x1182   :  { %2597 = vmatprep.subr.bf16.mxu1 %v2596_v10 }
0x1183   :  { %2599 = vmatpush3.bf16.msra.mxu1 %v2596_v10 }
0x1186   :  { %2523 = vmatmul.mubr.msk.f32.vlgmr.msra.gmra.mrb[24].mxu1 %vm195_vm1, %v2770_v3 }
0x1187   :  { %2525 = vmatprep.mubr.msk.f32.mxu1 %vm195_vm1, %v2771_v37 }
0x118a   :  { %2526 = vmatmul.mubr.msk.f32.gmra.mrb[26].mxu1 %vm195_vm1, %v2772_v39 }
0x1259   :  { %v3610_v21 = vpop.f32.mrb[24].mxu1 }
0x125a   :  { %v2110_v14 = vmul.f32 %v3610_v21, %v3610_v21  ;;  %v3614_v40 = vpop.f32.mrb[25].mxu1 }
0x125b   :  { %v2109_v29 = vmul.f32 %v3614_v40, %v3614_v40 }
0x125c   :  { %2119 = vrot.lane.b32.xlu0 %v2110_v14, %s2803_s28 }
0x125d   :  { %2117 = vrot.lane.b32.xlu1 %v2109_v29, %s2803_s28  ;;  %v3620_v1 = vpop.f32.mrb[26].mxu1 }
0x125e   :  { %v2112_v57 = vmul.f32 %v3620_v1, %v3620_v1  ;;  %v3624_v45 = vpop.f32.mrb[27].mxu1 }
0x125f   :  { %v2111_v33 = vmul.f32 %v3624_v45, %v3624_v45 }
0x1260   :  { %2146 = vperm.xlu0 %2702, %v3629_v55  }
0x1261   :  { %2123 = vrot.lane.b32.xlu1 %v2112_v57, %s2803_s28 }
0x1264   :  { %2703 = vset.pattern.permute.xlu0 %v2821_v56 }
0x1265   :  { %2121 = vrot.lane.b32.xlu1 %v2111_v33, %s2803_s28  ;;  %2182 = vperm.xlu0 %2703, %v3639_v60   ;;  %s2370_s28 = sshll.u32 %s2825_s1, 4  ;;  %s2371_s28 = int_to_ptr.vmem [resolvable:$true] %s2370_s28 }
0x1266   :  { %p2782_p1 = scmp.lt.s32.totalorder %s2371_s28, %s2371_s28 }
0x1269   :  { %2142 = vperm.xlu1 %2701, %v3639_v60   ;;  %2194 = vperm.xlu0 %2703, %v3646_v46  }
0x126d   :  { %2150 = vperm.xlu1 %2701, %v3652_v17   ;;  %2708 = vset.pattern.permute.xlu0 %v2806_v13 }
0x1271   :  { %2154 = vperm.xlu1 %2701, %v3646_v46  }
0x1275   :  { %2704 = vset.pattern.permute.xlu1 %v2821_v56 }
0x1276   :  { %2186 = vperm.xlu1 %2704, %v3629_v55  }
0x127a   :  { %2190 = vperm.xlu1 %2704, %v3652_v17  }
0x127e   :  { %2705 = vset.pattern.permute.xlu1 %v2805_v12 }
0x12ce   :  { %v2120_v53 = vpop.permute.xlu0 %2119 }
0x12cf   :  { %v2130_v48 = vsub.f32 %v3610_v21, %v2120_v53  ;;  %v2118_v38 = vpop.permute.xlu1 %2117 }
0x12d0   :  { %v2129_v54 = vsub.f32 %v3614_v40, %v2118_v38 }
0x12d1   :  { %v2134_v6 = vadd.f32 1e-05, %v2130_v48 }
0x12d2   :  { %v2133_v51 = vadd.f32 1e-05, %v2129_v54 }
0x12d3   :  { %v2124_v5 = vpop.permute.xlu1 %2123  ;;  %2754 = vrsqrt.f32 %v2134_v6 }
0x12d4   :  { %2756 = vrsqrt.f32 %v2133_v51  ;;  %v2132_v52 = vsub.f32 %v3620_v1, %v2124_v5 }
0x12d6   :  { %v2136_v58 = vadd.f32 1e-05, %v2132_v52 }
0x12d7   :  { %v2122_v59 = vpop.permute.xlu1 %2121 }
0x12d8   :  { %v2131_v2 = vsub.f32 %v3624_v45, %v2122_v59 }
0x12da   :  { %v2135_v11 = vadd.f32 1e-05, %v2131_v2 }
0x12dc   :  { %2758 = vrsqrt.f32 %v2135_v11 }
0x12dd   :  { %v2755_v61 = vpop.eup %2754  ;;  %2760 = vrsqrt.f32 %v2136_v58 }
0x12de   :  { %v2757_v62 = vpop.eup %2756 }
0x12df   :  { %v2147_v9 = vpop.permute.xlu0 %2146 }
0x12e0   :  { %v2158_v47 = vmul.f32 %v2755_v61, %v2147_v9 }
0x12e2   :  { %2167 = vrot.lane.b32.xlu0 %v2158_v47, %s2807_s29 }
0x12e4   :  { %v2183_v30 = vpop.permute.xlu0 %2182 }
0x12e6   :  { %v2759_v19 = vpop.eup %2758 }
0x12e7   :  { %v2761_v25 = vpop.eup %2760 }
0x12e8   :  { %v2143_v49 = vpop.permute.xlu1 %2142  ;;  %v2195_v31 = vpop.permute.xlu0 %2194 }
0x12e9   :  { %v2157_v16 = vmul.f32 %v2757_v62, %v2143_v49 }
0x12eb   :  { %2165 = vrot.lane.b32.xlu1 %v2157_v16, %s2807_s29 }
0x12ec   :  { %v2151_v22 = vpop.permute.xlu1 %2150 }
0x12ed   :  { %v2159_v24 = vmul.f32 %v2759_v19, %v2151_v22 }
0x12ef   :  { %2169 = vrot.lane.b32.xlu1 %v2159_v24, %s2807_s29 }
0x12f0   :  { %v2155_v26 = vpop.permute.xlu1 %2154 }
0x12f1   :  { %v2160_v42 = vmul.f32 %v2761_v25, %v2155_v26 }
0x12f3   :  { %2202 = vperm.xlu1 %2705, %v2157_v16   ;;  %2171 = vrot.lane.b32.xlu0 %v2160_v42, %s2807_s29  ;;  %s2777_s29 = scalar_lea.vmem %s2371_s28, 32 }
0x12f4   :  { %p2778_p0 = scmp.ne.s32.totalorder %s2371_s28, %s2777_s29  ;;  %p2783_p2 = scmp.lt.s32.totalorder %s2777_s29, %s2777_s29 }
0x12f5   :  { %v2187_v23 = vpop.permute.xlu1 %2186 }
0x12f6   :  { %p2784_p3 = por %p2783_p2, %p2782_p1 }
0x12f7   :  { %2706 = vset.pattern.permute.xlu1 %v2806_v13  ;;  %2258 = vperm.xlu0 %2708, %v2160_v42  }
0x12f8   :  { %2246 = vperm.xlu1 %2706, %v2157_v16   ;;  %p2785_p4 = pnand %p2784_p3, %p2778_p0 }
0x12f9   :  { %v2191_v7 = vpop.permute.xlu1 %2190 }
0x12fb   :  { %2709 = vset.pattern.permute.xlu0 %v2805_v12 }
0x12fc   :  { %2250 = vperm.xlu1 %2706, %v2158_v47   ;;  %2206 = vperm.xlu0 %2709, %v2158_v47  }
0x1300   :  { %2707 = vset.pattern.permute.xlu1 %v2805_v12  ;;  %2210 = vperm.xlu0 %2709, %v2159_v24  }
0x1301   :  { %2214 = vperm.xlu1 %2707, %v2160_v42  }
0x1304   :  { %2712 = vset.pattern.permute.xlu0 %v2808_v43 }
0x1305   :  { %2710 = vset.pattern.permute.xlu1 %v2822_v15 }
0x1306   :  { %2294 = vperm.xlu1 %2710, %v3639_v60  }
0x130a   :  { %2711 = vset.pattern.permute.xlu1 %v2806_v13 }
0x130b   :  { %2254 = vperm.xlu1 %2711, %v2159_v24  }
0x130f   :  { %2714 = vset.pattern.permute.xlu1 %v2808_v43 }
0x1354   :  { %v2168_v32 = vpop.permute.xlu0 %2167 }
0x1355   :  { %v2178_v8 = vmul.f32 %v3610_v21, %v2168_v32  ;;  %v2823_v21 = vmov 23  }
0x1357   :  { %v2198_v12 = vsub.f32 %v2187_v23, %v2178_v8 }
0x1359   :  { %2228 = vperm.xlu0 %2712, %v2198_v12  }
0x135d   :  { %2713 = vset.pattern.permute.xlu0 %v2809_v44  ;;  %v2166_v35 = vpop.permute.xlu1 %2165 }
0x135e   :  { %v2177_v4 = vmul.f32 %v2166_v35, %v3614_v40  ;;  %2270 = vperm.xlu0 %2713, %v2198_v12  }
0x1360   :  { %v2197_v27 = vsub.f32 %v2183_v30, %v2177_v4 }
0x1361   :  { %v2170_v3 = vpop.permute.xlu1 %2169 }
0x1362   :  { %2223 = vperm.xlu1 %2714, %v2197_v27   ;;  %v2179_v39 = vmul.f32 %v2170_v3, %v3624_v45 }
0x1364   :  { %v2199_v20 = vsub.f32 %v2191_v7, %v2179_v39 }
0x1365   :  { %v2172_v13 = vpop.permute.xlu0 %2171 }
0x1366   :  { %v2180_v10 = vmul.f32 %v3620_v1, %v2172_v13  ;;  %2715 = vset.pattern.permute.xlu1 %v2809_v44 }
0x1367   :  { %2266 = vperm.xlu1 %2715, %v2197_v27  }
0x1368   :  { %v2200_v37 = vsub.f32 %v2195_v31, %v2180_v10 }
0x136a   :  { %2278 = vperm.xlu0 %2713, %v2200_v37  }
0x136b   :  { %2716 = vset.pattern.permute.xlu1 %v2808_v43 }
0x136c   :  { %2238 = vperm.xlu1 %2716, %v2200_v37  }
0x136e   :  { %2719 = vset.pattern.permute.xlu0 %v2822_v15 }
0x136f   :  { %2302 = vperm.xlu0 %2719, %v3652_v17  }
0x1370   :  { %2233 = vperm.xlu1 %2716, %v2199_v20  }
0x1372   :  { %v2203_v43 = vpop.permute.xlu1 %2202 }
0x1373   :  { %2721 = vset.pattern.permute.xlu0 %v2823_v21 }
0x1374   :  { %2717 = vset.pattern.permute.xlu1 %v2809_v44 }
0x1375   :  { %2274 = vperm.xlu1 %2717, %v2199_v20  }
0x1376   :  { %v2259_v57 = vpop.permute.xlu0 %2258 }
0x1377   :  { %v2247_v14 = vpop.permute.xlu1 %2246 }
0x1379   :  { %2718 = vset.pattern.permute.xlu1 %v2822_v15 }
0x137a   :  { %2298 = vperm.xlu1 %2718, %v3629_v55   ;;  %v2217_v55 = vmul.f32 %v2203_v43, %v3540_v28  ;;  %v2264_v28 = vmul.f32 %v2259_v57, %v3579_v34  ;;  %v2824_v43 = vmov 1966171168  }
0x137b   :  { %v2251_v40 = vpop.permute.xlu1 %2250  ;;  %v2207_v33 = vpop.permute.xlu0 %2206 }
0x137c   :  { %v2262_v5 = vmul.f32 %v2251_v40, %v3556_v0  ;;  %v2347_v40 = vlaneseq }
0x137e   :  { %2306 = vperm.xlu1 %2718, %v3646_v46   ;;  %v2261_v46 = vmul.f32 %v2247_v14, %v3542_v50  ;;  %v2345_v14 = vunpack.c.l.s4 %v2824_v43  ;;  %vm2361_vm5 = vcmp.lt.s32.totalorder %v2347_v40, 256 }
0x137f   :  { %v2211_v17 = vpop.permute.xlu0 %2210 }
0x1380   :  { %v2215_v29 = vpop.permute.xlu1 %2214  ;;  %v2219_v54 = vmul.f32 %v2211_v17, %v3559_v63 }
0x1381   :  { %v2220_v50 = vmul.f32 %v2215_v29, %v3573_v18 }
0x1382   :  { %2720 = vset.pattern.permute.xlu1 %v2823_v21 }
0x1383   :  { %2336 = vperm.xlu1 %2720, %v3639_v60   ;;  %v2218_v60 = vmul.f32 %v2207_v33, %v3547_v41  ;;  %v2346_v33 = vunpack.c.0.s8 %v2345_v14 }
0x1385   :  { %v2295_v1 = vpop.permute.xlu1 %2294 }
0x138a   :  { %v2255_v45 = vpop.permute.xlu1 %2254 }
0x138b   :  { %v2263_v2 = vmul.f32 %v2255_v45, %v3565_v36 }
0x13d8   :  { %v2229_v53 = vpop.permute.xlu0 %2228 }
0x13d9   :  { %v2242_v52 = vadd.f32 %v2229_v53, %v2218_v60 }
0x13db   :  { %v2287_v16 = vmax.f32 %v2242_v52, 0.0 }
0x13dd   :  { %v2271_v6 = vpop.permute.xlu0 %2270 }
0x13de   :  { %v2282_v11 = vadd.f32 %v2271_v6, %v2262_v5 }
0x13e0   :  { %v2288_v63 = vmax.f32 %v2282_v11, 0.0 }
0x13e1   :  { %v2224_v56 = vpop.permute.xlu1 %2223 }
0x13e2   :  { %v2241_v59 = vadd.f32 %v2224_v56, %v2217_v55  ;;  %v2348_v56 = vshrl.u32 %v2347_v40, 7 }
0x13e4   :  { %v2285_v62 = vmax.f32 %v2241_v59, 0.0 }
0x13e6   :  { %v2267_v44 = vpop.permute.xlu1 %2266  ;;  %v2309_v25 = vmul.f32 %v2295_v1, %v2285_v62 }
0x13e7   :  { %v2281_v51 = vadd.f32 %v2267_v44, %v2261_v46 }
0x13e9   :  { %v2279_v61 = vpop.permute.xlu0 %2278  ;;  %v2286_v41 = vmax.f32 %v2281_v51, 0.0 }
0x13ea   :  { %v2284_v49 = vadd.f32 %v2279_v61, %v2264_v28 }
0x13eb   :  { %v2239_v48 = vpop.permute.xlu1 %2238  ;;  %v2310_v26 = vmul.f32 %v2295_v1, %v2286_v41 }
0x13ec   :  { %v2244_v0 = vadd.f32 %v2239_v48, %v2220_v50  ;;  %v2292_v30 = vmax.f32 %v2284_v49, 0.0  ;;  %v2349_v48 = vsub.s32 %v2346_v33, %v2348_v56 }
0x13ee   :  { %v2303_v24 = vpop.permute.xlu0 %2302  ;;  %v2291_v31 = vmax.f32 %v2244_v0, 0.0 }
0x13ef   :  { %v2234_v38 = vpop.permute.xlu1 %2233 }
0x13f0   :  { %v2243_v9 = vadd.f32 %v2234_v38, %v2219_v54 }
0x13f2   :  { %v2289_v19 = vmax.f32 %v2243_v9, 0.0 }
0x13f4   :  { %v2275_v47 = vpop.permute.xlu1 %2274  ;;  %v2313_v34 = vmul.f32 %v2303_v24, %v2289_v19 }
0x13f5   :  { %v2283_v58 = vadd.f32 %v2275_v47, %v2263_v2 }
0x13f7   :  { %v2290_v22 = vmax.f32 %v2283_v58, 0.0 }
0x13f9   :  { %v2299_v36 = vpop.permute.xlu1 %2298  ;;  %v2314_v23 = vmul.f32 %v2303_v24, %v2290_v22 }
0x13fa   :  { %v2311_v42 = vmul.f32 %v2299_v36, %v2287_v16  ;;  %v2312_v15 = vmul.f32 %v2299_v36, %v2288_v63 }
0x13fc   :  { %v2317_v18 = vadd.f32 %v2311_v42, %v2309_v25  ;;  %v2326_v32 = vadd.f32 %v2312_v15, %v2310_v26 }
0x13fd   :  { %v2307_v8 = vpop.permute.xlu1 %2306 }
0x13fe   :  { %v2318_v12 = vadd.f32 %v2317_v18, %v2313_v34  ;;  %v2327_v7 = vadd.f32 %v2326_v32, %v2314_v23  ;;  %v2315_v35 = vmul.f32 %v2307_v8, %v2291_v31  ;;  %v2316_v4 = vmul.f32 %v2307_v8, %v2292_v30 }
0x1400   :  { %v2319_v27 = vadd.f32 %v2318_v12, %v2315_v35  ;;  %v2328_v13 = vadd.f32 %v2327_v7, %v2316_v4 }
0x1402   :  { %v2320_v10 = vrot.slane %v2319_v27, 4  ;;  %v2329_v3 = vrot.slane %v2328_v13, 4  ;;  %v2337_v17 = vpop.permute.xlu1 %2336 }
0x1404   :  { %v2321_v37 = vadd.f32 %v2320_v10, %v2319_v27  ;;  %v2330_v39 = vadd.f32 %v2329_v3, %v2328_v13 }
0x1406   :  { %v2322_v20 = vrot.slane %v2321_v37, 2  ;;  %v2331_v21 = vrot.slane %v2330_v39, 2 }
0x1408   :  { %v2323_v29 = vadd.f32 %v2322_v20, %v2321_v37  ;;  %v2332_v1 = vadd.f32 %v2331_v21, %v2330_v39 }
0x140a   :  { %v2324_v57 = vrot.slane %v2323_v29, 1  ;;  %v2333_v45 = vrot.slane %v2332_v1, 1 }
0x140c   :  { %v2325_v44 = vadd.f32 %v2324_v57, %v2323_v29  ;;  %v2334_v53 = vadd.f32 %v2333_v45, %v2332_v1 }
0x140e   :  { %v2339_v38 = vadd.f32 %v2337_v17, %v2325_v44  ;;  %v2340_v55 = vadd.f32 %v2337_v17, %v2334_v53 }
0x1410   :  { %v2343_v46 = vcombine.low %v2339_v38, %v2340_v55 }
0x1412   :  { %v2350_v6 = vrot.slane %v2343_v46, %v2349_v48 }
0x1414   :  { %v2357_v60 = vrot.slane %v2350_v6, %v2349_v48 }
0x1416   :  { %2363 = vst.msk [vmem:[#allocation2] sm:$0x3] %vm2361_vm5, %v2357_v60 }
0x1417   :  { %2788 = shalt.err (!%p2785_p4)
}
0x1418   :  { %s2789_s12 = scalar_lea.hbm %s3709_s2, 32 }
0x1419   :  { %p2790_p5 = scmp.ne.s32.totalorder %s3709_s2, %s2789_s12  ;;  %p2793_p6 = scmp.lt.u32.totalorder %s2789_s12, %s3709_s2 }
0x141b   :  { %p2795_p7 = pnand %p2793_p6, %p2790_p5 }
0x141d   :  { %2798 = shalt.err (!%p2795_p7)
}
0x141e   :  { %2373 = dma.vmem_to_hbm [thread:$0]  %s2371_s28, 32, %s3709_s2, [#allocation3]  }
0x141f   :  { %2799 = dma.done.wait [#allocation3], 32  }
0x1420   :  { %2800 = vsyncadd [#allocation3], 4294967264 }
0x1421   :  { %2377 = vsyncpa [#allocation3], 1 }

</bundles_post_ra>
